<compile_context>
chip_gen: v6e
topology: v6e:2x2x1
jax: 0.10.0
libtpu: 0.0.40
codegen_flags: <defaults>
</compile_context>

<pallas_src>
import functools

import jax
import jax.numpy as jnp
from jax import lax
from jax.experimental import pallas as pl
from jax.experimental.pallas import tpu as pltpu

LN_EPS = 1e-6
_MB = 1024 * 1024


def _pair(v):
    return (v, v) if isinstance(v, int) else tuple(v)


def _round_up(n, m):
    return ((n + m - 1) // m) * m


def _vmem_capacity_bytes():
    """Physical per-core VMEM (generation-gated); conservative fallback."""
    try:
        cap = getattr(pltpu.get_tpu_info(), "vmem_capacity_bytes", None)
        if cap:
            return int(cap)
    except Exception:
        pass
    return 64 * _MB  # v7x per-TensorCore VMEM (smallest current generation)


def _ln_rows(x, gamma, beta, true_c, eps):
    """Channel-last LayerNorm over the last axis of x ([T, Cp], f32).

    Lanes >= true_c (channel padding) must be exactly zero on input; they are
    masked out of the variance and gamma/beta are zero there, so they stay 0.
    """
    cp = x.shape[-1]
    inv_c = 1.0 / float(true_c)
    mu = jnp.sum(x, axis=-1, keepdims=True) * inv_c
    d = x - mu
    if cp != true_c:
        lane = lax.broadcasted_iota(jnp.int32, (1, cp), 1)
        d = jnp.where(lane < true_c, d, 0.0)
    var = jnp.sum(d * d, axis=-1, keepdims=True) * inv_c
    return d * lax.rsqrt(var + eps) * gamma + beta


# ---------------------------------------------------------------------------
# Kernel 1: channel-last pre-LayerNorm over tokens (used only when pre_norm).
# ---------------------------------------------------------------------------
def _pre_ln_kernel(x_ref, g_ref, b_ref, o_ref, *, cin, eps):
    x = x_ref[...].astype(jnp.float32)
    o_ref[...] = _ln_rows(x, g_ref[...], b_ref[...], cin, eps).astype(o_ref.dtype)


def _pre_layernorm(h_nhwc, gamma, beta, *, eps, token_tile=1024):
    """Channel-last LayerNorm; bf16 output feeds the bf16 conv matmul."""
    B, H, W, C = h_nhwc.shape
    n = B * H * W
    tile = min(_round_up(token_tile, 256), _round_up(n, 256))
    n_pad = _round_up(n, tile)

    x2 = h_nhwc.reshape(n, C)  # native dtype; cast to f32 inside the kernel
    if n_pad != n:
        x2 = jnp.pad(x2, ((0, n_pad - n), (0, 0)))
    g = gamma.reshape(1, C).astype(jnp.float32)
    b = beta.reshape(1, C).astype(jnp.float32)

    est = 2 * tile * C * x2.dtype.itemsize + 2 * tile * C * 2 + tile * C * 4
    cap = _vmem_capacity_bytes()
    vmem_limit = int(min(cap - 8 * _MB, max(32 * _MB, 2 * est)))

    rep = lambda i: (0, 0)
    out = pl.pallas_call(
        functools.partial(_pre_ln_kernel, cin=C, eps=eps),
        out_shape=jax.ShapeDtypeStruct((n_pad, C), jnp.bfloat16),
        grid_spec=pltpu.PrefetchScalarGridSpec(
            num_scalar_prefetch=0,
            grid=(n_pad // tile,),
            in_specs=[
                pl.BlockSpec((tile, C), lambda i: (i, 0)),
                pl.BlockSpec((1, C), rep),
                pl.BlockSpec((1, C), rep),
            ],
            out_specs=pl.BlockSpec((tile, C), lambda i: (i, 0)),
        ),
        compiler_params=pltpu.CompilerParams(
            dimension_semantics=("parallel",), vmem_limit_bytes=vmem_limit),
    )(x2, g, b)
    return out[:n].reshape(B, H, W, C)


# ---------------------------------------------------------------------------
# Kernel 2: fused conv (im2col built in VMEM) + bias + optional post-LN.
# ---------------------------------------------------------------------------
def _conv_kernel(*refs, bt, m_tok, kh, sh, n_qj, g_cols, swc, cout, eps,
                 apply_post_norm):
    if apply_post_norm:
        x_ref, w_ref, b_ref, g_ref, bb_ref, o_ref, patch_ref = refs
    else:
        x_ref, w_ref, b_ref, o_ref, patch_ref = refs

    wv = w_ref[...]            # (K, cout_p) bf16, grid-invariant
    bv = b_ref[...]            # (1, cout_p) f32
    if apply_post_norm:
        gv = g_ref[...]
        bbv = bb_ref[...]

    for b in range(bt):
        # im2col in VMEM: each (ki, qj) tap is one contiguous 2-D slice of the
        # phase-folded input block (sh, bt, Hg*G, sw*cin).
        for ki in range(kh):
            qi, ri = ki // sh, ki % sh
            for qj in range(n_qj):
                src0 = qi * g_cols + qj
                col0 = (ki * n_qj + qj) * swc
                patch_ref[b, :, col0:col0 + swc] = (
                    x_ref[ri, b, src0:src0 + m_tok, :])

        # One MXU matmul per image: bf16 operands, f32 accumulation.
        y = jnp.dot(patch_ref[b], wv, preferred_element_type=jnp.float32)
        y = y + bv
        if apply_post_norm:
            y = _ln_rows(y, gv, bbv, cout, eps)
        o_ref[b] = y.astype(o_ref.dtype)


def downsampling(x, params, *, kernel_size, stride=1, padding=0,
                 pre_permute=False, use_pre_norm=False, use_post_norm=False,
                 tokens_per_step=4096, eps=LN_EPS):
    """Forward pass of the PyTorch `Downsampling` module.

    Input layout matches the PyTorch module: NHWC when pre_permute=True (the
    module permutes to NCHW before the conv), NCHW otherwise. Output is NHWC.
    """
    kh, kw = _pair(kernel_size)
    sh, sw = _pair(stride)
    ph, pw = _pair(padding)

    if use_pre_norm and not pre_permute:
        # TODO(synk): channels-first (NCHW) pre_norm not implemented; MetaFormer
        # only uses pre_norm together with pre_permute=True (channel-last LN).
        raise NotImplementedError("pre_norm requires pre_permute=True")

    out_dtype = x.dtype
    h = x if pre_permute else jnp.transpose(x, (0, 2, 3, 1))   # NHWC internally
    B, H, W, cin = h.shape
    w = params["w"]                                            # [kh, kw, cin, cout]
    cout = w.shape[-1]

    # ---- optional channel-last pre-LayerNorm (must precede zero padding) ----
    if use_pre_norm:
        h = _pre_layernorm(h, params["pre_g"], params["pre_b"], eps=eps)
    else:
        h = h.astype(jnp.bfloat16)

    # ---- conv geometry & phase-folded layout ----
    ho = (H + 2 * ph - kh) // sh + 1
    wo = (W + 2 * pw - kw) // sw + 1
    n_qj = (kw - 1) // sw + 1                      # horizontal taps per phase
    g_cols = wo + (n_qj - 1)                       # column groups per output row
    hg = ho + (kh - 1) // sh + (1 if n_qj > 1 else 0)   # row groups incl. halo
    swc = sw * cin                                 # lanes per column group
    m_tok = ho * g_cols                            # tokens per image (g_cols-wo are dropped)
    k_eff = kh * n_qj * swc                        # contraction (zero taps where >= kw)
    cout_p = _round_up(cout, 128)                  # lane-dense output channels

    # zero-pad (conv padding + alignment) and fold stride phases; this pad +
    # transpose is a single fused XLA copy pass (no HBM im2col materialization).
    ht, wt = sh * hg, sw * g_cols
    hp = jnp.pad(h, ((0, 0),
                     (ph, max(ht - ph - H, 0)),
                     (pw, max(wt - pw - W, 0)),
                     (0, 0)))
    hp = hp[:, :ht, :wt, :]                        # crop if the pad over-shot
    hp = hp.reshape(B, hg, sh, g_cols, swc)
    xt = jnp.transpose(hp, (2, 0, 1, 3, 4)).reshape(sh, B, hg * g_cols, swc)

    # conv weight / bias (lane-dense cout only; no contraction-dim padding).
    w_eff = jnp.pad(w, ((0, 0), (0, n_qj * sw - kw), (0, 0), (0, 0)))
    w_eff = w_eff.reshape(k_eff, cout)
    w_eff = jnp.pad(w_eff, ((0, 0), (0, cout_p - cout))).astype(jnp.bfloat16)
    bias = jnp.pad(params["b"].reshape(1, cout).astype(jnp.float32),
                   ((0, 0), (0, cout_p - cout)))

    # ---- batch tile chosen to fit a generation-gated VMEM budget ----
    cap = _vmem_capacity_bytes()
    budget = max(32 * _MB, min(cap * 3 // 4, cap - 16 * _MB))

    def vmem_bytes(bt):
        x_blk = sh * bt * _round_up(hg * g_cols, 16) * max(swc, 128) * 2
        w_blk = _round_up(k_eff, 16) * cout_p * 2
        o_blk = bt * _round_up(m_tok, 16) * cout_p * jnp.dtype(out_dtype).itemsize
        patch = bt * _round_up(m_tok, 16) * _round_up(k_eff, 128) * 2
        y_val = m_tok * cout_p * 4
        return 2 * x_blk + 2 * w_blk + 2 * o_blk + patch + y_val + 16 * cout_p * 4

    bt = max(1, min(B, tokens_per_step // max(m_tok, 1)))
    while bt > 1 and vmem_bytes(bt) > budget:
        bt -= 1
    b_pad = _round_up(B, bt)
    if b_pad != B:
        xt = jnp.pad(xt, ((0, 0), (0, b_pad - B), (0, 0), (0, 0)))

    vmem_limit = int(min(cap - 8 * _MB,
                         max(32 * _MB, vmem_bytes(bt) * 5 // 4 + 4 * _MB)))

    rep2 = lambda i: (0, 0)
    in_specs = [
        pl.BlockSpec((sh, bt, hg * g_cols, swc), lambda i: (0, i, 0, 0)),
        pl.BlockSpec((k_eff, cout_p), rep2),       # conv weight (grid-invariant)
        pl.BlockSpec((1, cout_p), rep2),           # conv bias
    ]
    args = [xt, w_eff, bias]
    if use_post_norm:
        post_g = jnp.pad(params["post_g"].reshape(1, cout).astype(jnp.float32),
                         ((0, 0), (0, cout_p - cout)))
        post_b = jnp.pad(params["post_b"].reshape(1, cout).astype(jnp.float32),
                         ((0, 0), (0, cout_p - cout)))
        in_specs += [pl.BlockSpec((1, cout_p), rep2),
                     pl.BlockSpec((1, cout_p), rep2)]
        args += [post_g, post_b]

    cost = pl.CostEstimate(
        flops=2 * b_pad * m_tok * k_eff * cout_p,
        transcendentals=b_pad * m_tok if use_post_norm else 0,
        bytes_accessed=(xt.size * 2 + w_eff.size * 2 + bias.size * 4
                        + b_pad * m_tok * cout_p * jnp.dtype(out_dtype).itemsize),
    )

    out = pl.pallas_call(
        functools.partial(
            _conv_kernel, bt=bt, m_tok=m_tok, kh=kh, sh=sh, n_qj=n_qj,
            g_cols=g_cols, swc=swc, cout=cout, eps=eps,
            apply_post_norm=use_post_norm),
        out_shape=jax.ShapeDtypeStruct((b_pad, m_tok, cout_p), out_dtype),
        grid_spec=pltpu.PrefetchScalarGridSpec(
            num_scalar_prefetch=0,
            grid=(b_pad // bt,),
            in_specs=in_specs,
            out_specs=pl.BlockSpec((bt, m_tok, cout_p), lambda i: (i, 0, 0)),
            scratch_shapes=[pltpu.VMEM((bt, m_tok, k_eff), jnp.bfloat16)],
        ),
        compiler_params=pltpu.CompilerParams(
            dimension_semantics=("parallel",), vmem_limit_bytes=vmem_limit),
        cost_estimate=cost,
    )(*args)

    # drop padded batch rows, the (g_cols - wo) helper columns and channel pad.
    out = out[:B].reshape(B, ho, g_cols, cout_p)[:, :, :wo, :cout]
    return out


# ---------------------------------------------------------------------------
# Pure-JAX reference + parameter init (PyTorch-style) for verification.
# ---------------------------------------------------------------------------
def _ln_ref(v, g, b, eps=LN_EPS):
    mu = jnp.mean(v, axis=-1, keepdims=True)
    var = jnp.mean((v - mu) ** 2, axis=-1, keepdims=True)
    return (v - mu) * lax.rsqrt(var + eps) * g + b


def downsampling_ref(x, params, *, kernel_size, stride=1, padding=0,
                     pre_permute=False, use_pre_norm=False, use_post_norm=False,
                     eps=LN_EPS):
    kh, kw = _pair(kernel_size)
    sh, sw = _pair(stride)
    ph, pw = _pair(padding)
    h = x if pre_permute else jnp.transpose(x, (0, 2, 3, 1))
    if use_pre_norm:
        h = _ln_ref(h, params["pre_g"], params["pre_b"], eps)
    y = lax.conv_general_dilated(
        h, params["w"], window_strides=(sh, sw),
        padding=[(ph, ph), (pw, pw)],
        dimension_numbers=("NHWC", "HWIO", "NHWC"))
    y = y + params["b"]
    if use_post_norm:
        y = _ln_ref(y, params["post_g"], params["post_b"], eps)
    return y


def init_params(key, cin, cout, kernel_size, *, use_pre_norm=False, use_post_norm=False):
    kh, kw = _pair(kernel_size)
    ks = jax.random.split(key, 6)
    fan_in = cin * kh * kw
    bound = 1.0 / (fan_in ** 0.5)
    params = {
        # nn.Conv2d default init ~ U(-1/sqrt(fan_in), 1/sqrt(fan_in)); HWIO layout.
        "w": jax.random.uniform(ks[0], (kh, kw, cin, cout), jnp.float32, -bound, bound),
        "b": jax.random.uniform(ks[1], (cout,), jnp.float32, -bound, bound),
    }
    if use_pre_norm:
        params["pre_g"] = 1.0 + 0.1 * jax.random.normal(ks[2], (cin,), jnp.float32)
        params["pre_b"] = 0.1 * jax.random.normal(ks[3], (cin,), jnp.float32)
    if use_post_norm:
        params["post_g"] = 1.0 + 0.1 * jax.random.normal(ks[4], (cout,), jnp.float32)
        params["post_b"] = 0.1 * jax.random.normal(ks[5], (cout,), jnp.float32)
    return params


if __name__ == "__main__":
    key = jax.random.PRNGKey(0)
    kx1, kp1, kx2, kp2 = jax.random.split(key, 4)

    B, H, W = 2, 16, 16
    cin, cout = 4, 8

    # Config 1: stage-to-stage downsample (pre_norm + pre_permute, NHWC input).
    x1 = jax.random.normal(kx1, (B, H, W, cin), jnp.float32)
    p1 = init_params(kp1, cin, cout, 3, use_pre_norm=True)
    cfg1 = dict(kernel_size=3, stride=2, padding=1,
                pre_permute=True, use_pre_norm=True, use_post_norm=False)
    o1 = jax.block_until_ready(downsampling(x1, p1, **cfg1))
    r1 = downsampling_ref(x1, p1, **cfg1)
    assert o1.shape == (B, 8, 8, cout), o1.shape
    # bf16 MXU operands (f32 accumulation) -> compare against f32 reference loosely.
    assert jnp.allclose(o1, r1, atol=3e-2, rtol=3e-2), float(jnp.max(jnp.abs(o1 - r1)))

    # Config 2: stem-style (NCHW input, conv + post_norm, no pre_norm/pre_permute).
    x2 = jax.random.normal(kx2, (B, cin, H, W), jnp.float32)
    p2 = init_params(kp2, cin, cout, 7, use_post_norm=True)
    cfg2 = dict(kernel_size=7, stride=4, padding=2,
                pre_permute=False, use_pre_norm=False, use_post_norm=True)
    o2 = jax.block_until_ready(downsampling(x2, p2, **cfg2))
    r2 = downsampling_ref(x2, p2, **cfg2)
    assert o2.shape == (B, 4, 4, cout), o2.shape
    # post-LayerNorm amplifies the bf16 matmul error slightly -> looser tolerance.
    assert jnp.allclose(o2, r2, atol=5e-2, rtol=5e-2), float(jnp.max(jnp.abs(o2 - r2)))

    print("KERNEL_OK")
</pallas_src>

<mosaic_0001>
module attributes {stable_mosaic.version = 11 : i64} {
  func.func @_pre_ln_kernel(%arg0: i32, %arg1: memref<512x4xf32, #tpu.memory_space<vmem>>, %arg2: memref<1x4xf32, #tpu.memory_space<vmem>>, %arg3: memref<1x4xf32, #tpu.memory_space<vmem>>, %arg4: memref<512x4xbf16, #tpu.memory_space<vmem>>) attributes {dimension_semantics = [#tpu.dimension_semantics<parallel>], iteration_bounds = array<i64: 1>, scalar_prefetch = 0 : i64, scratch_operands = 0 : i64, tpu.core_type = #tpu.core_type<tc>, window_params = [{transform_indices = @transform_0, window_bounds = array<i64: 512, 4>}, {pipeline_mode = #tpu.pipeline_mode<synchronous>, transform_indices = @transform_1, window_bounds = array<i64: 1, 4>}, {pipeline_mode = #tpu.pipeline_mode<synchronous>, transform_indices = @transform_2, window_bounds = array<i64: 1, 4>}, {transform_indices = @transform_3, window_bounds = array<i64: 512, 4>}]} {
    %c0 = arith.constant 0 : index
    %c0_0 = arith.constant 0 : index
    %0 = vector.load %arg1[%c0, %c0_0] : memref<512x4xf32, #tpu.memory_space<vmem>>, vector<512x4xf32>
    %c0_1 = arith.constant 0 : index
    %c0_2 = arith.constant 0 : index
    %1 = vector.load %arg2[%c0_1, %c0_2] : memref<1x4xf32, #tpu.memory_space<vmem>>, vector<1x4xf32>
    %c0_3 = arith.constant 0 : index
    %c0_4 = arith.constant 0 : index
    %2 = vector.load %arg3[%c0_3, %c0_4] : memref<1x4xf32, #tpu.memory_space<vmem>>, vector<1x4xf32>
    %cst = arith.constant dense<0.000000e+00> : vector<512xf32>
    %3 = vector.multi_reduction <add>, %0, %cst [1] : vector<512x4xf32> to vector<512xf32>
    %4 = vector.shape_cast %3 : vector<512xf32> to vector<512x1xf32>
    %cst_5 = arith.constant 2.500000e-01 : f32
    %5 = vector.broadcast %cst_5 : f32 to vector<512x1xf32>
    %6 = arith.mulf %4, %5 : vector<512x1xf32>
    %7 = vector.broadcast %6 : vector<512x1xf32> to vector<512x4xf32>
    %8 = arith.subf %0, %7 : vector<512x4xf32>
    %9 = arith.mulf %8, %8 : vector<512x4xf32>
    %cst_6 = arith.constant dense<0.000000e+00> : vector<512xf32>
    %10 = vector.multi_reduction <add>, %9, %cst_6 [1] : vector<512x4xf32> to vector<512xf32>
    %11 = vector.shape_cast %10 : vector<512xf32> to vector<512x1xf32>
    %cst_7 = arith.constant 2.500000e-01 : f32
    %12 = vector.broadcast %cst_7 : f32 to vector<512x1xf32>
    %13 = arith.mulf %11, %12 : vector<512x1xf32>
    %cst_8 = arith.constant 9.99999997E-7 : f32
    %14 = vector.broadcast %cst_8 : f32 to vector<512x1xf32>
    %15 = arith.addf %13, %14 : vector<512x1xf32>
    %16 = math.rsqrt %15 : vector<512x1xf32>
    %17 = vector.broadcast %16 : vector<512x1xf32> to vector<512x4xf32>
    %18 = arith.mulf %8, %17 : vector<512x4xf32>
    %19 = vector.broadcast %1 : vector<1x4xf32> to vector<512x4xf32>
    %20 = arith.mulf %18, %19 : vector<512x4xf32>
    %21 = vector.broadcast %2 : vector<1x4xf32> to vector<512x4xf32>
    %22 = arith.addf %20, %21 : vector<512x4xf32>
    %23 = arith.truncf %22 : vector<512x4xf32> to vector<512x4xbf16>
    %c0_9 = arith.constant 0 : index
    %c0_10 = arith.constant 0 : index
    %24 = vector.load %arg4[%c0_9, %c0_10] : memref<512x4xbf16, #tpu.memory_space<vmem>>, vector<512x4xbf16>
    tpu.vector_store %arg4[%c0_9, %c0_10], %23 {strides = array<i32>} : memref<512x4xbf16, #tpu.memory_space<vmem>>, vector<512x4xbf16>,
    return
  }
  func.func @transform_0(%arg0: i32) -> (i32, i32) {
    %c0_i32 = arith.constant 0 : i32
    %c0_i32_0 = arith.constant 0 : i32
    return %arg0, %c0_i32 : i32, i32
  }
  func.func @transform_1(%arg0: i32) -> (i32, i32) {
    %c0_i32 = arith.constant 0 : i32
    %c0_i32_0 = arith.constant 0 : i32
    %c0_i32_1 = arith.constant 0 : i32
    return %c0_i32, %c0_i32_0 : i32, i32
  }
  func.func @transform_2(%arg0: i32) -> (i32, i32) {
    %c0_i32 = arith.constant 0 : i32
    %c0_i32_0 = arith.constant 0 : i32
    %c0_i32_1 = arith.constant 0 : i32
    return %c0_i32, %c0_i32_0 : i32, i32
  }
  func.func @transform_3(%arg0: i32) -> (i32, i32) {
    %c0_i32 = arith.constant 0 : i32
    %c0_i32_0 = arith.constant 0 : i32
    return %arg0, %c0_i32 : i32, i32
  }
}

</mosaic_0001>

<bundles_post_ra>
// kernel: tpu_custom_call.1
= control target key start
LH: loop header
LB: loop body
LE: loop exit
PB: predicated region body
PF: predicated region fallthrough
CT: control target
= control target key end

     0   :  { %vm80_vm0 = vcmask 31744   ;;  %vm1309_vm1 = vcmask 27648   ;;  %s2958_s0 = inlined_call_operand.vmem [shape: f32[512,4], index: 0, kind: input, shape index: {}]   ;;  %s2959_s1 = inlined_call_operand.vmem [shape: f32[1,4], index: 1, kind: input, shape index: {}]   ;;  %s2960_s2 = inlined_call_operand.vmem [shape: f32[1,4], index: 2, kind: input, shape index: {}]   ;;  %s2961_s3 = inlined_call_operand.vmem [shape: bf16[512,4], index: 3, kind: output, shape index: {}]  }
   0x1   :  { %v1661_v0 = vld [vmem:[%s2958_s0] sm:$0xff]  ;;  %v1666_v1 = vld [vmem:[%s2958_s0 + $0x10] sm:$0xff]  ;;  %v1671_v2 = vld [vmem:[%s2958_s0 + $0x8] sm:$0xff] }
   0x2   :  { %v81_v3 = vsel %vm80_vm0, %v1661_v0, 0.0  ;;  %v87_v4 = vsel %vm80_vm0, %v1666_v1, 0.0  ;;  %v1680_v5 = vld [vmem:[%s2958_s0 + $0x18] sm:$0xff]  ;;  %v84_v6 = vsel %vm80_vm0, %v1671_v2, 0.0  ;;  %v1689_v8 = vld [vmem:[%s2958_s0 + $0x20] sm:$0xff]  ;;  %v1694_v9 = vld [vmem:[%s2958_s0 + $0x28] sm:$0xff] }
   0x3   :  { %82 = vadd.xlane.f32.xlu0 %v81_v3  ;;  %88 = vadd.xlane.f32.xlu1 %v87_v4  ;;  %v90_v7 = vsel %vm80_vm0, %v1680_v5, 0.0  ;;  %v93_v10 = vsel %vm80_vm0, %v1689_v8, 0.0  ;;  %v96_v11 = vsel %vm80_vm0, %v1694_v9, 0.0  ;;  %v1703_v12 = vld [vmem:[%s2958_s0 + $0x30] sm:$0xff]  ;;  %v1708_v13 = vld [vmem:[%s2958_s0 + $0x38] sm:$0xff]  ;;  %v1717_v16 = vld [vmem:[%s2958_s0 + $0x40] sm:$0xff] }
   0x4   :  { %v99_v14 = vsel %vm80_vm0, %v1703_v12, 0.0  ;;  %v102_v15 = vsel %vm80_vm0, %v1708_v13, 0.0  ;;  %v1722_v17 = vld [vmem:[%s2958_s0 + $0x48] sm:$0xff]  ;;  %v105_v18 = vsel %vm80_vm0, %v1717_v16, 0.0  ;;  %v1731_v20 = vld [vmem:[%s2958_s0 + $0x50] sm:$0xff]  ;;  %v1736_v21 = vld [vmem:[%s2958_s0 + $0x58] sm:$0xff] }
   0x5   :  { %v108_v19 = vsel %vm80_vm0, %v1722_v17, 0.0  ;;  %v111_v22 = vsel %vm80_vm0, %v1731_v20, 0.0  ;;  %v114_v23 = vsel %vm80_vm0, %v1736_v21, 0.0  ;;  %v1745_v24 = vld [vmem:[%s2958_s0 + $0x60] sm:$0xff]  ;;  %v1750_v25 = vld [vmem:[%s2958_s0 + $0x68] sm:$0xff]  ;;  %v1759_v28 = vld [vmem:[%s2958_s0 + $0x70] sm:$0xff] }
   0x6   :  { %v117_v26 = vsel %vm80_vm0, %v1745_v24, 0.0  ;;  %v120_v27 = vsel %vm80_vm0, %v1750_v25, 0.0  ;;  %v1764_v29 = vld [vmem:[%s2958_s0 + $0x78] sm:$0xff]  ;;  %v123_v30 = vsel %vm80_vm0, %v1759_v28, 0.0  ;;  %v1773_v32 = vld [vmem:[%s2958_s0 + $0x80] sm:$0xff]  ;;  %v1778_v33 = vld [vmem:[%s2958_s0 + $0x88] sm:$0xff] }
   0x7   :  { %85 = vadd.xlane.f32.xlu0 %v84_v6  ;;  %91 = vadd.xlane.f32.xlu1 %v90_v7  ;;  %v126_v31 = vsel %vm80_vm0, %v1764_v29, 0.0  ;;  %v129_v34 = vsel %vm80_vm0, %v1773_v32, 0.0  ;;  %v132_v35 = vsel %vm80_vm0, %v1778_v33, 0.0  ;;  %v1787_v36 = vld [vmem:[%s2958_s0 + $0x90] sm:$0xff]  ;;  %v1792_v37 = vld [vmem:[%s2958_s0 + $0x98] sm:$0xff]  ;;  %v1801_v40 = vld [vmem:[%s2958_s0 + $0xa0] sm:$0xff] }
   0x8   :  { %v135_v38 = vsel %vm80_vm0, %v1787_v36, 0.0  ;;  %v138_v39 = vsel %vm80_vm0, %v1792_v37, 0.0  ;;  %v1806_v41 = vld [vmem:[%s2958_s0 + $0xa8] sm:$0xff]  ;;  %v141_v42 = vsel %vm80_vm0, %v1801_v40, 0.0  ;;  %v1815_v44 = vld [vmem:[%s2958_s0 + $0xb0] sm:$0xff]  ;;  %v1820_v45 = vld [vmem:[%s2958_s0 + $0xb8] sm:$0xff] }
   0x9   :  { %v144_v43 = vsel %vm80_vm0, %v1806_v41, 0.0  ;;  %v147_v46 = vsel %vm80_vm0, %v1815_v44, 0.0  ;;  %v150_v47 = vsel %vm80_vm0, %v1820_v45, 0.0  ;;  %v1829_v48 = vld [vmem:[%s2958_s0 + $0xc0] sm:$0xff]  ;;  %v1834_v49 = vld [vmem:[%s2958_s0 + $0xc8] sm:$0xff]  ;;  %v1843_v52 = vld [vmem:[%s2958_s0 + $0xd0] sm:$0xff] }
   0xa   :  { %v153_v50 = vsel %vm80_vm0, %v1829_v48, 0.0  ;;  %v156_v51 = vsel %vm80_vm0, %v1834_v49, 0.0  ;;  %v1848_v53 = vld [vmem:[%s2958_s0 + $0xd8] sm:$0xff]  ;;  %v159_v54 = vsel %vm80_vm0, %v1843_v52, 0.0  ;;  %v1857_v56 = vld [vmem:[%s2958_s0 + $0xe0] sm:$0xff]  ;;  %v1862_v57 = vld [vmem:[%s2958_s0 + $0xe8] sm:$0xff] }
   0xb   :  { %94 = vadd.xlane.f32.xlu0 %v93_v10  ;;  %97 = vadd.xlane.f32.xlu1 %v96_v11  ;;  %v162_v55 = vsel %vm80_vm0, %v1848_v53, 0.0  ;;  %v165_v58 = vsel %vm80_vm0, %v1857_v56, 0.0  ;;  %v168_v59 = vsel %vm80_vm0, %v1862_v57, 0.0  ;;  %v1871_v60 = vld [vmem:[%s2958_s0 + $0xf0] sm:$0xff]  ;;  %v1876_v61 = vld [vmem:[%s2958_s0 + $0xf8] sm:$0xff]  ;;  %v1885_v3 = vld [vmem:[%s2958_s0 + $0x100] sm:$0xff] }
   0xc   :  { %v171_v62 = vsel %vm80_vm0, %v1871_v60, 0.0  ;;  %v174_v63 = vsel %vm80_vm0, %v1876_v61, 0.0  ;;  %v1890_v4 = vld [vmem:[%s2958_s0 + $0x108] sm:$0xff]  ;;  %v177_v6 = vsel %vm80_vm0, %v1885_v3, 0.0  ;;  %v1899_v10 = vld [vmem:[%s2958_s0 + $0x110] sm:$0xff]  ;;  %v1904_v11 = vld [vmem:[%s2958_s0 + $0x118] sm:$0xff] }
   0xd   :  { %v180_v7 = vsel %vm80_vm0, %v1890_v4, 0.0 }
   0xf   :  { %100 = vadd.xlane.f32.xlu0 %v99_v14  ;;  %103 = vadd.xlane.f32.xlu1 %v102_v15  ;;  %v183_v14 = vsel %vm80_vm0, %v1899_v10, 0.0  ;;  %v186_v15 = vsel %vm80_vm0, %v1904_v11, 0.0 }
  0x13   :  { %106 = vadd.xlane.f32.xlu0 %v105_v18  ;;  %109 = vadd.xlane.f32.xlu1 %v108_v19  ;;  %v1913_v18 = vld [vmem:[%s2958_s0 + $0x120] sm:$0xff]  ;;  %v1918_v19 = vld [vmem:[%s2958_s0 + $0x128] sm:$0xff] }
  0x17   :  { %112 = vadd.xlane.f32.xlu0 %v111_v22  ;;  %115 = vadd.xlane.f32.xlu1 %v114_v23  ;;  %v189_v22 = vsel %vm80_vm0, %v1913_v18, 0.0  ;;  %v192_v23 = vsel %vm80_vm0, %v1918_v19, 0.0 }
  0x1b   :  { %118 = vadd.xlane.f32.xlu0 %v117_v26  ;;  %121 = vadd.xlane.f32.xlu1 %v120_v27  ;;  %v1927_v26 = vld [vmem:[%s2958_s0 + $0x130] sm:$0xff]  ;;  %v1932_v27 = vld [vmem:[%s2958_s0 + $0x138] sm:$0xff] }
  0x1f   :  { %124 = vadd.xlane.f32.xlu0 %v123_v30  ;;  %127 = vadd.xlane.f32.xlu1 %v126_v31  ;;  %v195_v30 = vsel %vm80_vm0, %v1927_v26, 0.0  ;;  %v198_v31 = vsel %vm80_vm0, %v1932_v27, 0.0 }
  0x23   :  { %130 = vadd.xlane.f32.xlu0 %v129_v34  ;;  %133 = vadd.xlane.f32.xlu1 %v132_v35  ;;  %v1941_v34 = vld [vmem:[%s2958_s0 + $0x140] sm:$0xff]  ;;  %v1946_v35 = vld [vmem:[%s2958_s0 + $0x148] sm:$0xff] }
  0x27   :  { %136 = vadd.xlane.f32.xlu0 %v135_v38  ;;  %139 = vadd.xlane.f32.xlu1 %v138_v39  ;;  %v201_v38 = vsel %vm80_vm0, %v1941_v34, 0.0  ;;  %v204_v39 = vsel %vm80_vm0, %v1946_v35, 0.0 }
  0x2b   :  { %142 = vadd.xlane.f32.xlu0 %v141_v42  ;;  %145 = vadd.xlane.f32.xlu1 %v144_v43  ;;  %v1955_v42 = vld [vmem:[%s2958_s0 + $0x150] sm:$0xff]  ;;  %v1960_v43 = vld [vmem:[%s2958_s0 + $0x158] sm:$0xff] }
  0x2f   :  { %148 = vadd.xlane.f32.xlu0 %v147_v46  ;;  %151 = vadd.xlane.f32.xlu1 %v150_v47  ;;  %v207_v46 = vsel %vm80_vm0, %v1955_v42, 0.0  ;;  %v210_v47 = vsel %vm80_vm0, %v1960_v43, 0.0 }
  0x33   :  { %154 = vadd.xlane.f32.xlu0 %v153_v50  ;;  %157 = vadd.xlane.f32.xlu1 %v156_v51  ;;  %v1969_v50 = vld [vmem:[%s2958_s0 + $0x160] sm:$0xff]  ;;  %v1974_v51 = vld [vmem:[%s2958_s0 + $0x168] sm:$0xff] }
  0x37   :  { %160 = vadd.xlane.f32.xlu0 %v159_v54  ;;  %163 = vadd.xlane.f32.xlu1 %v162_v55  ;;  %v213_v54 = vsel %vm80_vm0, %v1969_v50, 0.0  ;;  %v216_v55 = vsel %vm80_vm0, %v1974_v51, 0.0 }
  0x3b   :  { %166 = vadd.xlane.f32.xlu0 %v165_v58  ;;  %169 = vadd.xlane.f32.xlu1 %v168_v59  ;;  %v1983_v58 = vld [vmem:[%s2958_s0 + $0x170] sm:$0xff]  ;;  %v1988_v59 = vld [vmem:[%s2958_s0 + $0x178] sm:$0xff] }
  0x3f   :  { %172 = vadd.xlane.f32.xlu0 %v171_v62  ;;  %175 = vadd.xlane.f32.xlu1 %v174_v63  ;;  %v219_v62 = vsel %vm80_vm0, %v1983_v58, 0.0  ;;  %v222_v63 = vsel %vm80_vm0, %v1988_v59, 0.0 }
  0x43   :  { %178 = vadd.xlane.f32.xlu0 %v177_v6  ;;  %181 = vadd.xlane.f32.xlu1 %v180_v7  ;;  %v1997_v6 = vld [vmem:[%s2958_s0 + $0x180] sm:$0xff]  ;;  %v2002_v7 = vld [vmem:[%s2958_s0 + $0x188] sm:$0xff] }
  0x47   :  { %184 = vadd.xlane.f32.xlu0 %v183_v14  ;;  %187 = vadd.xlane.f32.xlu1 %v186_v15  ;;  %v225_v14 = vsel %vm80_vm0, %v1997_v6, 0.0  ;;  %v228_v15 = vsel %vm80_vm0, %v2002_v7, 0.0 }
  0x4b   :  { %190 = vadd.xlane.f32.xlu0 %v189_v22  ;;  %193 = vadd.xlane.f32.xlu1 %v192_v23  ;;  %v2011_v22 = vld [vmem:[%s2958_s0 + $0x190] sm:$0xff]  ;;  %v2016_v23 = vld [vmem:[%s2958_s0 + $0x198] sm:$0xff] }
  0x4c   :  { %2995 = vst [vmem:[#allocation2_spill] sm:$0xff] %v2011_v22  ;;  %2996 = vst [vmem:[#allocation3_spill] sm:$0xff] %v2016_v23 }
  0x4f   :  { %196 = vadd.xlane.f32.xlu0 %v195_v30  ;;  %199 = vadd.xlane.f32.xlu1 %v198_v31  ;;  %v231_v30 = vsel %vm80_vm0, %v2011_v22, 0.0  ;;  %v234_v31 = vsel %vm80_vm0, %v2016_v23, 0.0 }
  0x53   :  { %202 = vadd.xlane.f32.xlu0 %v201_v38  ;;  %205 = vadd.xlane.f32.xlu1 %v204_v39  ;;  %v2025_v38 = vld [vmem:[%s2958_s0 + $0x1a0] sm:$0xff]  ;;  %v2030_v39 = vld [vmem:[%s2958_s0 + $0x1a8] sm:$0xff] }
  0x54   :  { %2997 = vst [vmem:[#allocation4_spill] sm:$0xff] %v2025_v38  ;;  %2998 = vst [vmem:[#allocation5_spill] sm:$0xff] %v2030_v39 }
  0x57   :  { %208 = vadd.xlane.f32.xlu0 %v207_v46  ;;  %211 = vadd.xlane.f32.xlu1 %v210_v47  ;;  %v237_v46 = vsel %vm80_vm0, %v2025_v38, 0.0  ;;  %v240_v47 = vsel %vm80_vm0, %v2030_v39, 0.0 }
  0x5b   :  { %214 = vadd.xlane.f32.xlu0 %v213_v54  ;;  %217 = vadd.xlane.f32.xlu1 %v216_v55  ;;  %v2039_v54 = vld [vmem:[%s2958_s0 + $0x1b0] sm:$0xff]  ;;  %v2044_v55 = vld [vmem:[%s2958_s0 + $0x1b8] sm:$0xff] }
  0x5c   :  { %2999 = vst [vmem:[#allocation6_spill] sm:$0xff] %v2039_v54  ;;  %3000 = vst [vmem:[#allocation7_spill] sm:$0xff] %v2044_v55 }
  0x5f   :  { %220 = vadd.xlane.f32.xlu0 %v219_v62  ;;  %223 = vadd.xlane.f32.xlu1 %v222_v63  ;;  %v243_v62 = vsel %vm80_vm0, %v2039_v54, 0.0  ;;  %v246_v63 = vsel %vm80_vm0, %v2044_v55, 0.0 }
  0x63   :  { %226 = vadd.xlane.f32.xlu0 %v225_v14  ;;  %229 = vadd.xlane.f32.xlu1 %v228_v15  ;;  %v2053_v14 = vld [vmem:[%s2958_s0 + $0x1c0] sm:$0xff]  ;;  %v2058_v15 = vld [vmem:[%s2958_s0 + $0x1c8] sm:$0xff] }
  0x64   :  { %3001 = vst [vmem:[#allocation8_spill] sm:$0xff] %v2053_v14  ;;  %3002 = vst [vmem:[#allocation9_spill] sm:$0xff] %v2058_v15 }
  0x67   :  { %232 = vadd.xlane.f32.xlu0 %v231_v30  ;;  %235 = vadd.xlane.f32.xlu1 %v234_v31  ;;  %v249_v30 = vsel %vm80_vm0, %v2053_v14, 0.0  ;;  %v252_v31 = vsel %vm80_vm0, %v2058_v15, 0.0  ;;  %v2081_v15 = vld [vmem:[%s2958_s0 + $0x1e0] sm:$0xff]  ;;  %v2086_v14 = vld [vmem:[%s2958_s0 + $0x1e8] sm:$0xff] }
  0x68   :  { %3005 = vst [vmem:[#allocation12_spill] sm:$0xff] %v2081_v15  ;;  %3006 = vst [vmem:[#allocation13_spill] sm:$0xff] %v2086_v14 }
  0x6b   :  { %238 = vadd.xlane.f32.xlu0 %v237_v46  ;;  %241 = vadd.xlane.f32.xlu1 %v240_v47  ;;  %v2067_v46 = vld [vmem:[%s2958_s0 + $0x1d0] sm:$0xff]  ;;  %v2072_v47 = vld [vmem:[%s2958_s0 + $0x1d8] sm:$0xff] }
  0x6c   :  { %3003 = vst [vmem:[#allocation10_spill] sm:$0xff] %v2067_v46  ;;  %3004 = vst [vmem:[#allocation11_spill] sm:$0xff] %v2072_v47 }
  0x6f   :  { %244 = vadd.xlane.f32.xlu0 %v243_v62  ;;  %247 = vadd.xlane.f32.xlu1 %v246_v63  ;;  %v255_v62 = vsel %vm80_vm0, %v2067_v46, 0.0  ;;  %v258_v63 = vsel %vm80_vm0, %v2072_v47, 0.0  ;;  %v2095_v47 = vld [vmem:[%s2958_s0 + $0x1f0] sm:$0xff]  ;;  %v2100_v46 = vld [vmem:[%s2958_s0 + $0x1f8] sm:$0xff] }
  0x70   :  { %3007 = vst [vmem:[#allocation14_spill] sm:$0xff] %v2095_v47 }
  0x73   :  { %250 = vadd.xlane.f32.xlu0 %v249_v30  ;;  %253 = vadd.xlane.f32.xlu1 %v252_v31  ;;  %v261_v30 = vsel %vm80_vm0, %v2081_v15, 0.0  ;;  %v264_v31 = vsel %vm80_vm0, %v2086_v14, 0.0 }
  0x77   :  { %256 = vadd.xlane.f32.xlu0 %v255_v62  ;;  %259 = vadd.xlane.f32.xlu1 %v258_v63  ;;  %v267_v62 = vsel %vm80_vm0, %v2095_v47, 0.0  ;;  %v270_v63 = vsel %vm80_vm0, %v2100_v46, 0.0 }
  0x7b   :  { %262 = vadd.xlane.f32.xlu0 %v261_v30  ;;  %265 = vadd.xlane.f32.xlu1 %v264_v31 }
  0x7f   :  { %268 = vadd.xlane.f32.xlu0 %v267_v62  ;;  %271 = vadd.xlane.f32.xlu1 %v270_v63 }
  0x8c   :  { %v83_v14 = vpop.xlane.xlu0 %82  ;;  %v89_v15 = vpop.xlane.xlu1 %88 }
  0x8d   :  { %v273_v55 = vmul.f32 0.25, %v83_v14  ;;  %v275_v54 = vmul.f32 0.25, %v89_v15 }
  0x8f   :  { %v2107_v39 = vsub.f32 %v1661_v0, %v273_v55  ;;  %v2110_v38 = vsub.f32 %v1666_v1, %v275_v54 }
  0x90   :  { %v86_v30 = vpop.xlane.xlu0 %85  ;;  %v92_v31 = vpop.xlane.xlu1 %91 }
  0x91   :  { %3008 = vst [vmem:[#allocation15_spill] sm:$0xff] %v2110_v38  ;;  %v274_v23 = vmul.f32 0.25, %v86_v30  ;;  %v276_v22 = vmul.f32 0.25, %v92_v31  ;;  %v401_v47 = vmul.f32 %v2107_v39, %v2107_v39  ;;  %v403_v62 = vmul.f32 %v2110_v38, %v2110_v38 }
  0x93   :  { %v2117_v63 = vsub.f32 %v1671_v2, %v274_v23  ;;  %v2120_v14 = vsub.f32 %v1680_v5, %v276_v22  ;;  %v465_v0 = vsel %vm80_vm0, %v401_v47, 0.0  ;;  %v471_v55 = vsel %vm80_vm0, %v403_v62, 0.0 }
  0x94   :  { %466 = vadd.xlane.f32.xlu0 %v465_v0  ;;  %v95_v1 = vpop.xlane.xlu0 %94  ;;  %v98_v54 = vpop.xlane.xlu1 %97 }
  0x95   :  { %v277_v15 = vmul.f32 0.25, %v95_v1  ;;  %v278_v30 = vmul.f32 0.25, %v98_v54  ;;  %v402_v31 = vmul.f32 %v2117_v63, %v2117_v63  ;;  %v404_v38 = vmul.f32 %v2120_v14, %v2120_v14 }
  0x97   :  { %v2129_v2 = vsub.f32 %v1689_v8, %v277_v15  ;;  %v2132_v5 = vsub.f32 %v1694_v9, %v278_v30  ;;  %v468_v22 = vsel %vm80_vm0, %v402_v31, 0.0  ;;  %v474_v62 = vsel %vm80_vm0, %v404_v38, 0.0 }
  0x98   :  { %472 = vadd.xlane.f32.xlu0 %v471_v55  ;;  %469 = vadd.xlane.f32.xlu1 %v468_v22  ;;  %v101_v23 = vpop.xlane.xlu0 %100  ;;  %v104_v47 = vpop.xlane.xlu1 %103 }
  0x99   :  { %v279_v0 = vmul.f32 0.25, %v101_v23  ;;  %v280_v1 = vmul.f32 0.25, %v104_v47  ;;  %v405_v54 = vmul.f32 %v2129_v2, %v2129_v2  ;;  %v406_v8 = vmul.f32 %v2132_v5, %v2132_v5 }
  0x9b   :  { %v2141_v15 = vsub.f32 %v1703_v12, %v279_v0  ;;  %v2144_v9 = vsub.f32 %v1708_v13, %v280_v1  ;;  %v477_v55 = vsel %vm80_vm0, %v405_v54, 0.0  ;;  %v480_v31 = vsel %vm80_vm0, %v406_v8, 0.0 }
  0x9c   :  { %475 = vadd.xlane.f32.xlu1 %v474_v62  ;;  %478 = vadd.xlane.f32.xlu0 %v477_v55  ;;  %v107_v30 = vpop.xlane.xlu0 %106  ;;  %v110_v38 = vpop.xlane.xlu1 %109 }
  0x9d   :  { %v281_v22 = vmul.f32 0.25, %v107_v30  ;;  %v282_v23 = vmul.f32 0.25, %v110_v38  ;;  %v407_v47 = vmul.f32 %v2141_v15, %v2141_v15  ;;  %v408_v12 = vmul.f32 %v2144_v9, %v2144_v9 }
  0x9f   :  { %v2153_v0 = vsub.f32 %v1717_v16, %v281_v22  ;;  %v2156_v13 = vsub.f32 %v1722_v17, %v282_v23  ;;  %v483_v62 = vsel %vm80_vm0, %v407_v47, 0.0  ;;  %v486_v8 = vsel %vm80_vm0, %v408_v12, 0.0 }
  0xa0   :  { %481 = vadd.xlane.f32.xlu1 %v480_v31  ;;  %484 = vadd.xlane.f32.xlu0 %v483_v62  ;;  %v113_v1 = vpop.xlane.xlu0 %112  ;;  %v116_v54 = vpop.xlane.xlu1 %115 }
  0xa1   :  { %v283_v55 = vmul.f32 0.25, %v113_v1  ;;  %v284_v30 = vmul.f32 0.25, %v116_v54  ;;  %v409_v38 = vmul.f32 %v2153_v0, %v2153_v0  ;;  %v410_v16 = vmul.f32 %v2156_v13, %v2156_v13 }
  0xa3   :  { %v2165_v22 = vsub.f32 %v1731_v20, %v283_v55  ;;  %v2168_v17 = vsub.f32 %v1736_v21, %v284_v30  ;;  %v489_v31 = vsel %vm80_vm0, %v409_v38, 0.0  ;;  %v492_v12 = vsel %vm80_vm0, %v410_v16, 0.0 }
  0xa4   :  { %487 = vadd.xlane.f32.xlu1 %v486_v8  ;;  %490 = vadd.xlane.f32.xlu0 %v489_v31  ;;  %v119_v23 = vpop.xlane.xlu0 %118  ;;  %v122_v47 = vpop.xlane.xlu1 %121 }
  0xa5   :  { %v285_v62 = vmul.f32 0.25, %v119_v23  ;;  %v286_v1 = vmul.f32 0.25, %v122_v47  ;;  %v411_v54 = vmul.f32 %v2165_v22, %v2165_v22  ;;  %v412_v20 = vmul.f32 %v2168_v17, %v2168_v17 }
  0xa7   :  { %v2177_v55 = vsub.f32 %v1745_v24, %v285_v62  ;;  %v2180_v21 = vsub.f32 %v1750_v25, %v286_v1  ;;  %v495_v8 = vsel %vm80_vm0, %v411_v54, 0.0  ;;  %v498_v16 = vsel %vm80_vm0, %v412_v20, 0.0 }
  0xa8   :  { %493 = vadd.xlane.f32.xlu1 %v492_v12  ;;  %496 = vadd.xlane.f32.xlu0 %v495_v8  ;;  %v125_v30 = vpop.xlane.xlu0 %124  ;;  %v128_v38 = vpop.xlane.xlu1 %127 }
  0xa9   :  { %v287_v31 = vmul.f32 0.25, %v125_v30  ;;  %v288_v23 = vmul.f32 0.25, %v128_v38  ;;  %v413_v47 = vmul.f32 %v2177_v55, %v2177_v55  ;;  %v414_v24 = vmul.f32 %v2180_v21, %v2180_v21 }
  0xab   :  { %v2189_v62 = vsub.f32 %v1759_v28, %v287_v31  ;;  %v2192_v25 = vsub.f32 %v1764_v29, %v288_v23  ;;  %v501_v12 = vsel %vm80_vm0, %v413_v47, 0.0  ;;  %v504_v20 = vsel %vm80_vm0, %v414_v24, 0.0 }
  0xac   :  { %499 = vadd.xlane.f32.xlu1 %v498_v16  ;;  %502 = vadd.xlane.f32.xlu0 %v501_v12  ;;  %v131_v1 = vpop.xlane.xlu0 %130  ;;  %v134_v54 = vpop.xlane.xlu1 %133 }
  0xad   :  { %v289_v8 = vmul.f32 0.25, %v131_v1  ;;  %v290_v30 = vmul.f32 0.25, %v134_v54  ;;  %v415_v38 = vmul.f32 %v2189_v62, %v2189_v62  ;;  %v416_v28 = vmul.f32 %v2192_v25, %v2192_v25 }
  0xaf   :  { %v2201_v31 = vsub.f32 %v1773_v32, %v289_v8  ;;  %v2204_v29 = vsub.f32 %v1778_v33, %v290_v30  ;;  %v507_v16 = vsel %vm80_vm0, %v415_v38, 0.0  ;;  %v510_v24 = vsel %vm80_vm0, %v416_v28, 0.0 }
  0xb0   :  { %505 = vadd.xlane.f32.xlu1 %v504_v20  ;;  %508 = vadd.xlane.f32.xlu0 %v507_v16  ;;  %v137_v23 = vpop.xlane.xlu0 %136  ;;  %v140_v47 = vpop.xlane.xlu1 %139 }
  0xb1   :  { %v291_v12 = vmul.f32 0.25, %v137_v23  ;;  %v292_v1 = vmul.f32 0.25, %v140_v47  ;;  %v417_v54 = vmul.f32 %v2201_v31, %v2201_v31  ;;  %v418_v32 = vmul.f32 %v2204_v29, %v2204_v29 }
  0xb3   :  { %v2213_v8 = vsub.f32 %v1787_v36, %v291_v12  ;;  %v2216_v33 = vsub.f32 %v1792_v37, %v292_v1  ;;  %v513_v20 = vsel %vm80_vm0, %v417_v54, 0.0  ;;  %v516_v28 = vsel %vm80_vm0, %v418_v32, 0.0 }
  0xb4   :  { %511 = vadd.xlane.f32.xlu1 %v510_v24  ;;  %514 = vadd.xlane.f32.xlu0 %v513_v20  ;;  %v143_v30 = vpop.xlane.xlu0 %142  ;;  %v146_v38 = vpop.xlane.xlu1 %145 }
  0xb5   :  { %v293_v16 = vmul.f32 0.25, %v143_v30  ;;  %v294_v23 = vmul.f32 0.25, %v146_v38  ;;  %v419_v47 = vmul.f32 %v2213_v8, %v2213_v8  ;;  %v420_v36 = vmul.f32 %v2216_v33, %v2216_v33 }
  0xb7   :  { %v2225_v12 = vsub.f32 %v1801_v40, %v293_v16  ;;  %v2228_v37 = vsub.f32 %v1806_v41, %v294_v23  ;;  %v519_v24 = vsel %vm80_vm0, %v419_v47, 0.0  ;;  %v522_v32 = vsel %vm80_vm0, %v420_v36, 0.0 }
  0xb8   :  { %517 = vadd.xlane.f32.xlu1 %v516_v28  ;;  %520 = vadd.xlane.f32.xlu0 %v519_v24  ;;  %v149_v1 = vpop.xlane.xlu0 %148  ;;  %v152_v54 = vpop.xlane.xlu1 %151 }
  0xb9   :  { %v295_v20 = vmul.f32 0.25, %v149_v1  ;;  %v296_v30 = vmul.f32 0.25, %v152_v54  ;;  %v421_v38 = vmul.f32 %v2225_v12, %v2225_v12  ;;  %v422_v40 = vmul.f32 %v2228_v37, %v2228_v37 }
  0xbb   :  { %v2237_v16 = vsub.f32 %v1815_v44, %v295_v20  ;;  %v2240_v41 = vsub.f32 %v1820_v45, %v296_v30  ;;  %v525_v28 = vsel %vm80_vm0, %v421_v38, 0.0  ;;  %v528_v36 = vsel %vm80_vm0, %v422_v40, 0.0 }
  0xbc   :  { %523 = vadd.xlane.f32.xlu1 %v522_v32  ;;  %526 = vadd.xlane.f32.xlu0 %v525_v28  ;;  %v155_v23 = vpop.xlane.xlu0 %154  ;;  %v158_v47 = vpop.xlane.xlu1 %157 }
  0xbd   :  { %v297_v24 = vmul.f32 0.25, %v155_v23  ;;  %v298_v1 = vmul.f32 0.25, %v158_v47  ;;  %v423_v54 = vmul.f32 %v2237_v16, %v2237_v16  ;;  %v424_v44 = vmul.f32 %v2240_v41, %v2240_v41 }
  0xbf   :  { %v2249_v20 = vsub.f32 %v1829_v48, %v297_v24  ;;  %v2252_v45 = vsub.f32 %v1834_v49, %v298_v1  ;;  %v531_v32 = vsel %vm80_vm0, %v423_v54, 0.0  ;;  %v534_v40 = vsel %vm80_vm0, %v424_v44, 0.0 }
  0xc0   :  { %529 = vadd.xlane.f32.xlu1 %v528_v36  ;;  %532 = vadd.xlane.f32.xlu0 %v531_v32  ;;  %v161_v30 = vpop.xlane.xlu0 %160  ;;  %v164_v38 = vpop.xlane.xlu1 %163 }
  0xc1   :  { %v299_v28 = vmul.f32 0.25, %v161_v30  ;;  %v300_v23 = vmul.f32 0.25, %v164_v38  ;;  %v425_v47 = vmul.f32 %v2249_v20, %v2249_v20  ;;  %v426_v48 = vmul.f32 %v2252_v45, %v2252_v45 }
  0xc3   :  { %v2261_v24 = vsub.f32 %v1843_v52, %v299_v28  ;;  %v2264_v49 = vsub.f32 %v1848_v53, %v300_v23  ;;  %v537_v36 = vsel %vm80_vm0, %v425_v47, 0.0  ;;  %v540_v44 = vsel %vm80_vm0, %v426_v48, 0.0 }
  0xc4   :  { %535 = vadd.xlane.f32.xlu1 %v534_v40  ;;  %538 = vadd.xlane.f32.xlu0 %v537_v36  ;;  %v167_v1 = vpop.xlane.xlu0 %166  ;;  %v170_v54 = vpop.xlane.xlu1 %169 }
  0xc5   :  { %v301_v32 = vmul.f32 0.25, %v167_v1  ;;  %v302_v30 = vmul.f32 0.25, %v170_v54  ;;  %v427_v38 = vmul.f32 %v2261_v24, %v2261_v24  ;;  %v428_v52 = vmul.f32 %v2264_v49, %v2264_v49 }
  0xc7   :  { %v2273_v28 = vsub.f32 %v1857_v56, %v301_v32  ;;  %v2276_v53 = vsub.f32 %v1862_v57, %v302_v30  ;;  %v543_v40 = vsel %vm80_vm0, %v427_v38, 0.0  ;;  %v546_v48 = vsel %vm80_vm0, %v428_v52, 0.0 }
  0xc8   :  { %541 = vadd.xlane.f32.xlu1 %v540_v44  ;;  %544 = vadd.xlane.f32.xlu0 %v543_v40  ;;  %v173_v23 = vpop.xlane.xlu0 %172  ;;  %v176_v47 = vpop.xlane.xlu1 %175 }
  0xc9   :  { %v303_v36 = vmul.f32 0.25, %v173_v23  ;;  %v304_v1 = vmul.f32 0.25, %v176_v47  ;;  %v429_v54 = vmul.f32 %v2273_v28, %v2273_v28  ;;  %v430_v56 = vmul.f32 %v2276_v53, %v2276_v53 }
  0xcb   :  { %v2285_v32 = vsub.f32 %v1871_v60, %v303_v36  ;;  %v2288_v57 = vsub.f32 %v1876_v61, %v304_v1  ;;  %v549_v44 = vsel %vm80_vm0, %v429_v54, 0.0  ;;  %v552_v52 = vsel %vm80_vm0, %v430_v56, 0.0 }
  0xcc   :  { %547 = vadd.xlane.f32.xlu1 %v546_v48  ;;  %550 = vadd.xlane.f32.xlu0 %v549_v44  ;;  %v179_v30 = vpop.xlane.xlu0 %178  ;;  %v182_v38 = vpop.xlane.xlu1 %181 }
  0xcd   :  { %v305_v40 = vmul.f32 0.25, %v179_v30  ;;  %v306_v23 = vmul.f32 0.25, %v182_v38  ;;  %v431_v47 = vmul.f32 %v2285_v32, %v2285_v32  ;;  %v432_v60 = vmul.f32 %v2288_v57, %v2288_v57 }
  0xcf   :  { %v2297_v36 = vsub.f32 %v1885_v3, %v305_v40  ;;  %v2300_v61 = vsub.f32 %v1890_v4, %v306_v23  ;;  %v555_v48 = vsel %vm80_vm0, %v431_v47, 0.0  ;;  %v558_v56 = vsel %vm80_vm0, %v432_v60, 0.0 }
  0xd0   :  { %553 = vadd.xlane.f32.xlu1 %v552_v52  ;;  %556 = vadd.xlane.f32.xlu0 %v555_v48  ;;  %v185_v1 = vpop.xlane.xlu0 %184  ;;  %v188_v54 = vpop.xlane.xlu1 %187 }
  0xd1   :  { %v307_v44 = vmul.f32 0.25, %v185_v1  ;;  %v308_v30 = vmul.f32 0.25, %v188_v54  ;;  %v433_v38 = vmul.f32 %v2297_v36, %v2297_v36  ;;  %v434_v3 = vmul.f32 %v2300_v61, %v2300_v61 }
  0xd3   :  { %v2309_v40 = vsub.f32 %v1899_v10, %v307_v44  ;;  %v2312_v4 = vsub.f32 %v1904_v11, %v308_v30  ;;  %v561_v52 = vsel %vm80_vm0, %v433_v38, 0.0  ;;  %v564_v60 = vsel %vm80_vm0, %v434_v3, 0.0 }
  0xd4   :  { %559 = vadd.xlane.f32.xlu1 %v558_v56  ;;  %562 = vadd.xlane.f32.xlu0 %v561_v52  ;;  %v191_v23 = vpop.xlane.xlu0 %190  ;;  %v194_v47 = vpop.xlane.xlu1 %193 }
  0xd5   :  { %v309_v48 = vmul.f32 0.25, %v191_v23  ;;  %v310_v1 = vmul.f32 0.25, %v194_v47  ;;  %v435_v54 = vmul.f32 %v2309_v40, %v2309_v40  ;;  %v436_v10 = vmul.f32 %v2312_v4, %v2312_v4 }
  0xd7   :  { %v2321_v44 = vsub.f32 %v1913_v18, %v309_v48  ;;  %v2324_v11 = vsub.f32 %v1918_v19, %v310_v1  ;;  %v567_v56 = vsel %vm80_vm0, %v435_v54, 0.0  ;;  %v570_v3 = vsel %vm80_vm0, %v436_v10, 0.0 }
  0xd8   :  { %565 = vadd.xlane.f32.xlu1 %v564_v60  ;;  %568 = vadd.xlane.f32.xlu0 %v567_v56  ;;  %v197_v30 = vpop.xlane.xlu0 %196  ;;  %v200_v38 = vpop.xlane.xlu1 %199 }
  0xd9   :  { %v311_v52 = vmul.f32 0.25, %v197_v30  ;;  %v312_v23 = vmul.f32 0.25, %v200_v38  ;;  %v437_v47 = vmul.f32 %v2321_v44, %v2321_v44  ;;  %v438_v18 = vmul.f32 %v2324_v11, %v2324_v11 }
  0xdb   :  { %v2333_v48 = vsub.f32 %v1927_v26, %v311_v52  ;;  %v2336_v19 = vsub.f32 %v1932_v27, %v312_v23  ;;  %v573_v60 = vsel %vm80_vm0, %v437_v47, 0.0  ;;  %v576_v10 = vsel %vm80_vm0, %v438_v18, 0.0 }
  0xdc   :  { %571 = vadd.xlane.f32.xlu1 %v570_v3  ;;  %574 = vadd.xlane.f32.xlu0 %v573_v60  ;;  %v203_v1 = vpop.xlane.xlu0 %202  ;;  %v206_v54 = vpop.xlane.xlu1 %205 }
  0xdd   :  { %v313_v56 = vmul.f32 0.25, %v203_v1  ;;  %v314_v30 = vmul.f32 0.25, %v206_v54  ;;  %v439_v38 = vmul.f32 %v2333_v48, %v2333_v48  ;;  %v440_v26 = vmul.f32 %v2336_v19, %v2336_v19 }
  0xdf   :  { %v2345_v52 = vsub.f32 %v1941_v34, %v313_v56  ;;  %v2348_v27 = vsub.f32 %v1946_v35, %v314_v30  ;;  %v579_v3 = vsel %vm80_vm0, %v439_v38, 0.0  ;;  %v582_v18 = vsel %vm80_vm0, %v440_v26, 0.0 }
  0xe0   :  { %577 = vadd.xlane.f32.xlu1 %v576_v10  ;;  %580 = vadd.xlane.f32.xlu0 %v579_v3  ;;  %v209_v23 = vpop.xlane.xlu0 %208  ;;  %v212_v47 = vpop.xlane.xlu1 %211 }
  0xe1   :  { %v315_v60 = vmul.f32 0.25, %v209_v23  ;;  %v316_v1 = vmul.f32 0.25, %v212_v47  ;;  %v441_v54 = vmul.f32 %v2345_v52, %v2345_v52  ;;  %v442_v34 = vmul.f32 %v2348_v27, %v2348_v27 }
  0xe3   :  { %v2357_v56 = vsub.f32 %v1955_v42, %v315_v60  ;;  %v2360_v35 = vsub.f32 %v1960_v43, %v316_v1  ;;  %v585_v10 = vsel %vm80_vm0, %v441_v54, 0.0  ;;  %v588_v26 = vsel %vm80_vm0, %v442_v34, 0.0 }
  0xe4   :  { %583 = vadd.xlane.f32.xlu1 %v582_v18  ;;  %586 = vadd.xlane.f32.xlu0 %v585_v10  ;;  %v215_v30 = vpop.xlane.xlu0 %214  ;;  %v218_v38 = vpop.xlane.xlu1 %217 }
  0xe5   :  { %v317_v3 = vmul.f32 0.25, %v215_v30  ;;  %v318_v23 = vmul.f32 0.25, %v218_v38  ;;  %v443_v47 = vmul.f32 %v2357_v56, %v2357_v56  ;;  %v444_v42 = vmul.f32 %v2360_v35, %v2360_v35 }
  0xe7   :  { %v2369_v60 = vsub.f32 %v1969_v50, %v317_v3  ;;  %v2372_v43 = vsub.f32 %v1974_v51, %v318_v23  ;;  %v591_v18 = vsel %vm80_vm0, %v443_v47, 0.0  ;;  %v594_v34 = vsel %vm80_vm0, %v444_v42, 0.0 }
  0xe8   :  { %589 = vadd.xlane.f32.xlu1 %v588_v26  ;;  %592 = vadd.xlane.f32.xlu0 %v591_v18  ;;  %v221_v1 = vpop.xlane.xlu0 %220  ;;  %v224_v54 = vpop.xlane.xlu1 %223 }
  0xe9   :  { %3009 = vst [vmem:[#allocation16_spill] sm:$0xff] %v2372_v43  ;;  %v319_v10 = vmul.f32 0.25, %v221_v1  ;;  %v320_v30 = vmul.f32 0.25, %v224_v54  ;;  %v445_v38 = vmul.f32 %v2369_v60, %v2369_v60  ;;  %v446_v50 = vmul.f32 %v2372_v43, %v2372_v43 }
  0xeb   :  { %v2381_v3 = vsub.f32 %v1983_v58, %v319_v10  ;;  %v2384_v51 = vsub.f32 %v1988_v59, %v320_v30  ;;  %v597_v26 = vsel %vm80_vm0, %v445_v38, 0.0  ;;  %v600_v42 = vsel %vm80_vm0, %v446_v50, 0.0 }
  0xec   :  { %595 = vadd.xlane.f32.xlu1 %v594_v34  ;;  %598 = vadd.xlane.f32.xlu0 %v597_v26  ;;  %v227_v23 = vpop.xlane.xlu0 %226  ;;  %v230_v47 = vpop.xlane.xlu1 %229 }
  0xed   :  { %3010 = vst [vmem:[#allocation17_spill] sm:$0xff] %v2381_v3  ;;  %3011 = vst [vmem:[#allocation18_spill] sm:$0xff] %v2384_v51  ;;  %v321_v18 = vmul.f32 0.25, %v227_v23  ;;  %v322_v1 = vmul.f32 0.25, %v230_v47  ;;  %v447_v54 = vmul.f32 %v2381_v3, %v2381_v3  ;;  %v448_v58 = vmul.f32 %v2384_v51, %v2384_v51 }
  0xef   :  { %v2393_v10 = vsub.f32 %v1997_v6, %v321_v18  ;;  %v2396_v59 = vsub.f32 %v2002_v7, %v322_v1  ;;  %v603_v34 = vsel %vm80_vm0, %v447_v54, 0.0  ;;  %v606_v50 = vsel %vm80_vm0, %v448_v58, 0.0  ;;  %v3014_v18 = vld [vmem:[#allocation2_spill] sm:$0xff]  ;;  %v3016_v7 = vld [vmem:[#allocation3_spill] sm:$0xff] }
  0xf0   :  { %601 = vadd.xlane.f32.xlu1 %v600_v42  ;;  %604 = vadd.xlane.f32.xlu0 %v603_v34  ;;  %v233_v30 = vpop.xlane.xlu0 %232  ;;  %v236_v38 = vpop.xlane.xlu1 %235 }
  0xf1   :  { %3012 = vst [vmem:[#allocation19_spill] sm:$0xff] %v2393_v10  ;;  %3013 = vst [vmem:[#allocation20_spill] sm:$0xff] %v2396_v59  ;;  %v323_v26 = vmul.f32 0.25, %v233_v30  ;;  %v324_v23 = vmul.f32 0.25, %v236_v38  ;;  %v449_v47 = vmul.f32 %v2393_v10, %v2393_v10  ;;  %v450_v6 = vmul.f32 %v2396_v59, %v2396_v59 }
  0xf3   :  { %v2405_v51 = vsub.f32 %v3014_v18, %v323_v26  ;;  %v2408_v1 = vsub.f32 %v3016_v7, %v324_v23  ;;  %v609_v42 = vsel %vm80_vm0, %v449_v47, 0.0  ;;  %v612_v34 = vsel %vm80_vm0, %v450_v6, 0.0  ;;  %v3018_v18 = vld [vmem:[#allocation4_spill] sm:$0xff]  ;;  %v3020_v23 = vld [vmem:[#allocation5_spill] sm:$0xff] }
  0xf4   :  { %607 = vadd.xlane.f32.xlu1 %v606_v50  ;;  %610 = vadd.xlane.f32.xlu0 %v609_v42  ;;  %v239_v54 = vpop.xlane.xlu0 %238  ;;  %v242_v58 = vpop.xlane.xlu1 %241 }
  0xf5   :  { %3015 = vst [vmem:[#allocation2_spill] sm:$0xff] %v2405_v51  ;;  %3017 = vst [vmem:[#allocation3_spill] sm:$0xff] %v2408_v1  ;;  %v325_v30 = vmul.f32 0.25, %v239_v54  ;;  %v326_v38 = vmul.f32 0.25, %v242_v58  ;;  %v451_v10 = vmul.f32 %v2405_v51, %v2405_v51  ;;  %v452_v26 = vmul.f32 %v2408_v1, %v2408_v1 }
  0xf7   :  { %v2417_v59 = vsub.f32 %v3018_v18, %v325_v30  ;;  %v2420_v7 = vsub.f32 %v3020_v23, %v326_v38  ;;  %v615_v50 = vsel %vm80_vm0, %v451_v10, 0.0  ;;  %v618_v42 = vsel %vm80_vm0, %v452_v26, 0.0  ;;  %v3022_v18 = vld [vmem:[#allocation6_spill] sm:$0xff]  ;;  %v3024_v38 = vld [vmem:[#allocation7_spill] sm:$0xff] }
  0xf8   :  { %613 = vadd.xlane.f32.xlu1 %v612_v34  ;;  %616 = vadd.xlane.f32.xlu0 %v615_v50  ;;  %v245_v47 = vpop.xlane.xlu0 %244  ;;  %v248_v6 = vpop.xlane.xlu1 %247 }
  0xf9   :  { %3019 = vst [vmem:[#allocation4_spill] sm:$0xff] %v2417_v59  ;;  %3021 = vst [vmem:[#allocation5_spill] sm:$0xff] %v2420_v7  ;;  %v327_v54 = vmul.f32 0.25, %v245_v47  ;;  %v328_v58 = vmul.f32 0.25, %v248_v6  ;;  %v453_v51 = vmul.f32 %v2417_v59, %v2417_v59  ;;  %v454_v30 = vmul.f32 %v2420_v7, %v2420_v7 }
  0xfb   :  { %v2429_v1 = vsub.f32 %v3022_v18, %v327_v54  ;;  %v2432_v23 = vsub.f32 %v3024_v38, %v328_v58  ;;  %v621_v10 = vsel %vm80_vm0, %v453_v51, 0.0  ;;  %v624_v50 = vsel %vm80_vm0, %v454_v30, 0.0  ;;  %v3026_v18 = vld [vmem:[#allocation8_spill] sm:$0xff]  ;;  %v3028_v58 = vld [vmem:[#allocation9_spill] sm:$0xff] }
  0xfc   :  { %619 = vadd.xlane.f32.xlu1 %v618_v42  ;;  %622 = vadd.xlane.f32.xlu0 %v621_v10  ;;  %v251_v34 = vpop.xlane.xlu0 %250  ;;  %v254_v26 = vpop.xlane.xlu1 %253 }
  0xfd   :  { %3023 = vst [vmem:[#allocation6_spill] sm:$0xff] %v2429_v1  ;;  %3025 = vst [vmem:[#allocation7_spill] sm:$0xff] %v2432_v23  ;;  %v329_v47 = vmul.f32 0.25, %v251_v34  ;;  %v330_v6 = vmul.f32 0.25, %v254_v26  ;;  %v455_v59 = vmul.f32 %v2429_v1, %v2429_v1  ;;  %v456_v54 = vmul.f32 %v2432_v23, %v2432_v23 }
  0xff   :  { %v2441_v7 = vsub.f32 %v3026_v18, %v329_v47  ;;  %v2444_v38 = vsub.f32 %v3028_v58, %v330_v6  ;;  %v627_v51 = vsel %vm80_vm0, %v455_v59, 0.0  ;;  %v630_v10 = vsel %vm80_vm0, %v456_v54, 0.0  ;;  %v3030_v18 = vld [vmem:[#allocation10_spill] sm:$0xff]  ;;  %v3032_v6 = vld [vmem:[#allocation11_spill] sm:$0xff] }
 0x100   :  { %625 = vadd.xlane.f32.xlu1 %v624_v50  ;;  %628 = vadd.xlane.f32.xlu0 %v627_v51  ;;  %v257_v42 = vpop.xlane.xlu0 %256  ;;  %v260_v30 = vpop.xlane.xlu1 %259 }
 0x101   :  { %3027 = vst [vmem:[#allocation8_spill] sm:$0xff] %v2441_v7  ;;  %3029 = vst [vmem:[#allocation9_spill] sm:$0xff] %v2444_v38  ;;  %v331_v34 = vmul.f32 0.25, %v257_v42  ;;  %v332_v26 = vmul.f32 0.25, %v260_v30  ;;  %v457_v1 = vmul.f32 %v2441_v7, %v2441_v7  ;;  %v458_v47 = vmul.f32 %v2444_v38, %v2444_v38 }
 0x103   :  { %v2453_v23 = vsub.f32 %v3030_v18, %v331_v34  ;;  %v2456_v58 = vsub.f32 %v3032_v6, %v332_v26  ;;  %v633_v59 = vsel %vm80_vm0, %v457_v1, 0.0  ;;  %v636_v51 = vsel %vm80_vm0, %v458_v47, 0.0  ;;  %v3034_v18 = vld [vmem:[#allocation12_spill] sm:$0xff]  ;;  %v3036_v26 = vld [vmem:[#allocation13_spill] sm:$0xff] }
 0x104   :  { %631 = vadd.xlane.f32.xlu1 %v630_v10  ;;  %634 = vadd.xlane.f32.xlu0 %v633_v59  ;;  %v263_v50 = vpop.xlane.xlu0 %262  ;;  %v266_v54 = vpop.xlane.xlu1 %265 }
 0x105   :  { %3031 = vst [vmem:[#allocation10_spill] sm:$0xff] %v2453_v23  ;;  %3033 = vst [vmem:[#allocation11_spill] sm:$0xff] %v2456_v58  ;;  %v333_v42 = vmul.f32 0.25, %v263_v50  ;;  %v334_v30 = vmul.f32 0.25, %v266_v54  ;;  %v459_v7 = vmul.f32 %v2453_v23, %v2453_v23  ;;  %v460_v34 = vmul.f32 %v2456_v58, %v2456_v58 }
 0x107   :  { %v2465_v38 = vsub.f32 %v3034_v18, %v333_v42  ;;  %v2468_v6 = vsub.f32 %v3036_v26, %v334_v30  ;;  %v639_v1 = vsel %vm80_vm0, %v459_v7, 0.0  ;;  %v642_v59 = vsel %vm80_vm0, %v460_v34, 0.0  ;;  %v3038_v18 = vld [vmem:[#allocation14_spill] sm:$0xff] }
 0x108   :  { %637 = vadd.xlane.f32.xlu1 %v636_v51  ;;  %640 = vadd.xlane.f32.xlu0 %v639_v1  ;;  %v269_v10 = vpop.xlane.xlu0 %268  ;;  %v272_v47 = vpop.xlane.xlu1 %271 }
 0x109   :  { %3035 = vst [vmem:[#allocation12_spill] sm:$0xff] %v2465_v38  ;;  %3037 = vst [vmem:[#allocation13_spill] sm:$0xff] %v2468_v6  ;;  %v335_v50 = vmul.f32 0.25, %v269_v10  ;;  %v336_v54 = vmul.f32 0.25, %v272_v47  ;;  %v461_v23 = vmul.f32 %v2465_v38, %v2465_v38  ;;  %v462_v42 = vmul.f32 %v2468_v6, %v2468_v6 }
 0x10b   :  { %v2477_v58 = vsub.f32 %v3038_v18, %v335_v50  ;;  %v2480_v30 = vsub.f32 %v2100_v46, %v336_v54  ;;  %v645_v7 = vsel %vm80_vm0, %v461_v23, 0.0  ;;  %v648_v51 = vsel %vm80_vm0, %v462_v42, 0.0 }
 0x10c   :  { %643 = vadd.xlane.f32.xlu1 %v642_v59  ;;  %646 = vadd.xlane.f32.xlu0 %v645_v7 }
 0x10d   :  { %3039 = vst [vmem:[#allocation14_spill] sm:$0xff] %v2477_v58  ;;  %3040 = vst [vmem:[#allocation21_spill] sm:$0xff] %v2480_v30  ;;  %v463_v34 = vmul.f32 %v2477_v58, %v2477_v58  ;;  %v464_v26 = vmul.f32 %v2480_v30, %v2480_v30 }
 0x10f   :  { %v651_v1 = vsel %vm80_vm0, %v463_v34, 0.0  ;;  %v654_v10 = vsel %vm80_vm0, %v464_v26, 0.0 }
 0x110   :  { %649 = vadd.xlane.f32.xlu1 %v648_v51  ;;  %652 = vadd.xlane.f32.xlu0 %v651_v1 }
 0x114   :  { %655 = vadd.xlane.f32.xlu1 %v654_v10 }
 0x11d   :  { %v467_v46 = vpop.xlane.xlu0 %466 }
 0x11e   :  { %v657_v47 = vmul.f32 0.25, %v467_v46 }
 0x120   :  { %v721_v23 = vadd.f32 1e-06, %v657_v47 }
 0x121   :  { %v470_v59 = vpop.xlane.xlu1 %469  ;;  %v473_v50 = vpop.xlane.xlu0 %472 }
 0x122   :  { %1508 = vrsqrt.f32 %v721_v23  ;;  %v658_v54 = vmul.f32 0.25, %v470_v59  ;;  %v659_v42 = vmul.f32 0.25, %v473_v50 }
 0x124   :  { %v722_v18 = vadd.f32 1e-06, %v658_v54  ;;  %v723_v7 = vadd.f32 1e-06, %v659_v42 }
 0x125   :  { %v476_v58 = vpop.xlane.xlu1 %475  ;;  %v479_v6 = vpop.xlane.xlu0 %478 }
 0x126   :  { %1510 = vrsqrt.f32 %v722_v18  ;;  %v660_v30 = vmul.f32 0.25, %v476_v58  ;;  %v661_v34 = vmul.f32 0.25, %v479_v6  ;;  %v2493_v58 = vld [vmem:[%s2959_s1] ss:$0 sm:$0xff] }
 0x127   :  { %1512 = vrsqrt.f32 %v723_v7  ;;  %v2499_v7 = vld [vmem:[%s2960_s2] ss:$0 sm:$0xff] }
 0x128   :  { %v724_v51 = vadd.f32 1e-06, %v660_v30  ;;  %v725_v1 = vadd.f32 1e-06, %v661_v34 }
 0x129   :  { %v482_v26 = vpop.xlane.xlu1 %481  ;;  %v485_v10 = vpop.xlane.xlu0 %484 }
 0x12a   :  { %1514 = vrsqrt.f32 %v724_v51  ;;  %v662_v46 = vmul.f32 0.25, %v482_v26  ;;  %v663_v47 = vmul.f32 0.25, %v485_v10 }
 0x12b   :  { %1516 = vrsqrt.f32 %v725_v1 }
 0x12c   :  { %v726_v38 = vadd.f32 1e-06, %v662_v46  ;;  %v727_v23 = vadd.f32 1e-06, %v663_v47 }
 0x12d   :  { %v488_v59 = vpop.xlane.xlu1 %487  ;;  %v491_v50 = vpop.xlane.xlu0 %490 }
 0x12e   :  { %1518 = vrsqrt.f32 %v726_v38  ;;  %v664_v54 = vmul.f32 0.25, %v488_v59  ;;  %v665_v42 = vmul.f32 0.25, %v491_v50  ;;  %v3041_v59 = vld [vmem:[#allocation15_spill] sm:$0xff] }
 0x12f   :  { %v1509_v3 = vpop.eup %1508  ;;  %1520 = vrsqrt.f32 %v727_v23 }
 0x130   :  { %v849_v6 = vmul.f32 %v1509_v3, %v2107_v39  ;;  %v728_v30 = vadd.f32 1e-06, %v664_v54  ;;  %v729_v18 = vadd.f32 1e-06, %v665_v42 }
 0x131   :  { %v494_v34 = vpop.xlane.xlu1 %493  ;;  %v497_v38 = vpop.xlane.xlu0 %496 }
 0x132   :  { %v919_v51 = vmul.f32 %v2493_v58, %v849_v6  ;;  %1522 = vrsqrt.f32 %v728_v30  ;;  %v666_v1 = vmul.f32 0.25, %v494_v34  ;;  %v667_v26 = vmul.f32 0.25, %v497_v38 }
 0x133   :  { %v1511_v10 = vpop.eup %1510  ;;  %1524 = vrsqrt.f32 %v729_v18 }
 0x134   :  { %v1513_v46 = vpop.eup %1512  ;;  %v989_v47 = vadd.f32 %v2499_v7, %v919_v51  ;;  %v850_v39 = vmul.f32 %v1511_v10, %v2117_v63  ;;  %v730_v3 = vadd.f32 1e-06, %v666_v1  ;;  %v731_v23 = vadd.f32 1e-06, %v667_v26 }
 0x135   :  { %v851_v50 = vmul.f32 %v1513_v46, %v3041_v59  ;;  %v500_v54 = vpop.xlane.xlu1 %499  ;;  %v503_v42 = vpop.xlane.xlu0 %502 }
 0x136   :  { %v1444_v43 = vpack.c.bf16 %v989_v47, %v989_v47  ;;  %v920_v6 = vmul.f32 %v2493_v58, %v850_v39  ;;  %1526 = vrsqrt.f32 %v730_v3  ;;  %v668_v30 = vmul.f32 0.25, %v500_v54 }
 0x137   :  { %v1515_v34 = vpop.eup %1514  ;;  %v921_v18 = vmul.f32 %v2493_v58, %v851_v50  ;;  %1528 = vrsqrt.f32 %v731_v23  ;;  %v669_v38 = vmul.f32 0.25, %v503_v42 }
 0x138   :  { %v1517_v51 = vpop.eup %1516  ;;  %1310 = vst.msk [vmem:[%s2961_s3] sm:$0xf] %vm1309_vm1, %v1444_v43  ;;  %v990_v63 = vadd.f32 %v2499_v7, %v920_v6  ;;  %v852_v1 = vmul.f32 %v1515_v34, %v2120_v14  ;;  %v732_v26 = vadd.f32 1e-06, %v668_v30 }
 0x139   :  { %v991_v10 = vadd.f32 %v2499_v7, %v921_v18  ;;  %v853_v46 = vmul.f32 %v1517_v51, %v2129_v2  ;;  %v733_v47 = vadd.f32 1e-06, %v669_v38  ;;  %v506_v39 = vpop.xlane.xlu1 %505  ;;  %v509_v3 = vpop.xlane.xlu0 %508 }
 0x13a   :  { %v1445_v23 = vpack.c.bf16 %v990_v63, %v990_v63  ;;  %v922_v59 = vmul.f32 %v2493_v58, %v852_v1  ;;  %1530 = vrsqrt.f32 %v732_v26  ;;  %v670_v50 = vmul.f32 0.25, %v506_v39 }
 0x13b   :  { %v1519_v54 = vpop.eup %1518  ;;  %v1446_v42 = vpack.c.bf16 %v991_v10, %v991_v10  ;;  %v923_v43 = vmul.f32 %v2493_v58, %v853_v46  ;;  %1532 = vrsqrt.f32 %v733_v47  ;;  %v671_v6 = vmul.f32 0.25, %v509_v3 }
 0x13c   :  { %v1521_v14 = vpop.eup %1520  ;;  %1311 = vst.msk [vmem:[%s2961_s3 + $0x4] sm:$0xf] %vm1309_vm1, %v1445_v23  ;;  %v992_v2 = vadd.f32 %v2499_v7, %v922_v59  ;;  %v854_v30 = vmul.f32 %v1519_v54, %v2132_v5  ;;  %v734_v34 = vadd.f32 1e-06, %v670_v50 }
 0x13d   :  { %1312 = vst.msk [vmem:[%s2961_s3 + $0x8] sm:$0xf] %vm1309_vm1, %v1446_v42  ;;  %v993_v18 = vadd.f32 %v2499_v7, %v923_v43  ;;  %v855_v38 = vmul.f32 %v1521_v14, %v2141_v15  ;;  %v735_v51 = vadd.f32 1e-06, %v671_v6  ;;  %v512_v63 = vpop.xlane.xlu1 %511  ;;  %v515_v1 = vpop.xlane.xlu0 %514 }
 0x13e   :  { %v1447_v26 = vpack.c.bf16 %v992_v2, %v992_v2  ;;  %v924_v10 = vmul.f32 %v2493_v58, %v854_v30  ;;  %1534 = vrsqrt.f32 %v734_v34  ;;  %v672_v46 = vmul.f32 0.25, %v512_v63 }
 0x13f   :  { %v1523_v47 = vpop.eup %1522  ;;  %v1448_v5 = vpack.c.bf16 %v993_v18, %v993_v18  ;;  %v925_v39 = vmul.f32 %v2493_v58, %v855_v38  ;;  %1536 = vrsqrt.f32 %v735_v51  ;;  %v673_v3 = vmul.f32 0.25, %v515_v1 }
 0x140   :  { %v1525_v23 = vpop.eup %1524  ;;  %1313 = vst.msk [vmem:[%s2961_s3 + $0xc] sm:$0xf] %vm1309_vm1, %v1447_v26  ;;  %v994_v15 = vadd.f32 %v2499_v7, %v924_v10  ;;  %v856_v59 = vmul.f32 %v1523_v47, %v2144_v9  ;;  %v736_v50 = vadd.f32 1e-06, %v672_v46 }
 0x141   :  { %1314 = vst.msk [vmem:[%s2961_s3 + $0x10] sm:$0xf] %vm1309_vm1, %v1448_v5  ;;  %v995_v54 = vadd.f32 %v2499_v7, %v925_v39  ;;  %v857_v42 = vmul.f32 %v1525_v23, %v2153_v0  ;;  %v737_v43 = vadd.f32 1e-06, %v673_v3  ;;  %v518_v6 = vpop.xlane.xlu1 %517  ;;  %v521_v14 = vpop.xlane.xlu0 %520 }
 0x142   :  { %v1449_v2 = vpack.c.bf16 %v994_v15, %v994_v15  ;;  %v926_v30 = vmul.f32 %v2493_v58, %v856_v59  ;;  %1538 = vrsqrt.f32 %v736_v50  ;;  %v674_v34 = vmul.f32 0.25, %v518_v6 }
 0x143   :  { %v1527_v18 = vpop.eup %1526  ;;  %v1450_v9 = vpack.c.bf16 %v995_v54, %v995_v54  ;;  %v927_v38 = vmul.f32 %v2493_v58, %v857_v42  ;;  %1540 = vrsqrt.f32 %v737_v43  ;;  %v675_v51 = vmul.f32 0.25, %v521_v14 }
 0x144   :  { %v1529_v63 = vpop.eup %1528  ;;  %1315 = vst.msk [vmem:[%s2961_s3 + $0x14] sm:$0xf] %vm1309_vm1, %v1449_v2  ;;  %v996_v0 = vadd.f32 %v2499_v7, %v926_v30  ;;  %v858_v1 = vmul.f32 %v1527_v18, %v2156_v13  ;;  %v738_v26 = vadd.f32 1e-06, %v674_v34 }
 0x145   :  { %1316 = vst.msk [vmem:[%s2961_s3 + $0x18] sm:$0xf] %vm1309_vm1, %v1450_v9  ;;  %v997_v10 = vadd.f32 %v2499_v7, %v927_v38  ;;  %v859_v46 = vmul.f32 %v1529_v63, %v2165_v22  ;;  %v739_v47 = vadd.f32 1e-06, %v675_v51  ;;  %v524_v5 = vpop.xlane.xlu1 %523  ;;  %v527_v39 = vpop.xlane.xlu0 %526 }
 0x146   :  { %v1451_v3 = vpack.c.bf16 %v996_v0, %v996_v0  ;;  %v928_v23 = vmul.f32 %v2493_v58, %v858_v1  ;;  %1542 = vrsqrt.f32 %v738_v26  ;;  %v676_v15 = vmul.f32 0.25, %v524_v5 }
 0x147   :  { %v1531_v59 = vpop.eup %1530  ;;  %v1452_v13 = vpack.c.bf16 %v997_v10, %v997_v10  ;;  %v929_v50 = vmul.f32 %v2493_v58, %v859_v46  ;;  %1544 = vrsqrt.f32 %v739_v47  ;;  %v677_v54 = vmul.f32 0.25, %v527_v39 }
 0x148   :  { %v1533_v42 = vpop.eup %1532  ;;  %1317 = vst.msk [vmem:[%s2961_s3 + $0x1c] sm:$0xf] %vm1309_vm1, %v1451_v3  ;;  %v998_v22 = vadd.f32 %v2499_v7, %v928_v23  ;;  %v860_v43 = vmul.f32 %v1531_v59, %v2168_v17  ;;  %v740_v6 = vadd.f32 1e-06, %v676_v15 }
 0x149   :  { %1318 = vst.msk [vmem:[%s2961_s3 + $0x20] sm:$0xf] %vm1309_vm1, %v1452_v13  ;;  %v999_v14 = vadd.f32 %v2499_v7, %v929_v50  ;;  %v861_v2 = vmul.f32 %v1533_v42, %v2177_v55  ;;  %v741_v30 = vadd.f32 1e-06, %v677_v54  ;;  %v530_v34 = vpop.xlane.xlu1 %529  ;;  %v533_v18 = vpop.xlane.xlu0 %532 }
 0x14a   :  { %v1453_v9 = vpack.c.bf16 %v998_v22, %v998_v22  ;;  %v930_v38 = vmul.f32 %v2493_v58, %v860_v43  ;;  %1546 = vrsqrt.f32 %v740_v6  ;;  %v678_v51 = vmul.f32 0.25, %v530_v34 }
 0x14b   :  { %v1535_v63 = vpop.eup %1534  ;;  %v1454_v17 = vpack.c.bf16 %v999_v14, %v999_v14  ;;  %v931_v0 = vmul.f32 %v2493_v58, %v861_v2  ;;  %1548 = vrsqrt.f32 %v741_v30  ;;  %v679_v1 = vmul.f32 0.25, %v533_v18 }
 0x14c   :  { %v1537_v26 = vpop.eup %1536  ;;  %1319 = vst.msk [vmem:[%s2961_s3 + $0x24] sm:$0xf] %vm1309_vm1, %v1453_v9  ;;  %v1000_v55 = vadd.f32 %v2499_v7, %v930_v38  ;;  %v862_v10 = vmul.f32 %v1535_v63, %v2180_v21  ;;  %v742_v46 = vadd.f32 1e-06, %v678_v51 }
 0x14d   :  { %1320 = vst.msk [vmem:[%s2961_s3 + $0x28] sm:$0xf] %vm1309_vm1, %v1454_v17  ;;  %v1001_v47 = vadd.f32 %v2499_v7, %v931_v0  ;;  %v863_v5 = vmul.f32 %v1537_v26, %v2189_v62  ;;  %v743_v39 = vadd.f32 1e-06, %v679_v1  ;;  %v536_v3 = vpop.xlane.xlu1 %535  ;;  %v539_v23 = vpop.xlane.xlu0 %538 }
 0x14e   :  { %v1455_v15 = vpack.c.bf16 %v1000_v55, %v1000_v55  ;;  %v932_v59 = vmul.f32 %v2493_v58, %v862_v10  ;;  %1550 = vrsqrt.f32 %v742_v46  ;;  %v680_v13 = vmul.f32 0.25, %v536_v3 }
 0x14f   :  { %v1539_v50 = vpop.eup %1538  ;;  %v1456_v21 = vpack.c.bf16 %v1001_v47, %v1001_v47  ;;  %v933_v54 = vmul.f32 %v2493_v58, %v863_v5  ;;  %1552 = vrsqrt.f32 %v743_v39  ;;  %v681_v42 = vmul.f32 0.25, %v539_v23 }
 0x150   :  { %v1541_v22 = vpop.eup %1540  ;;  %1321 = vst.msk [vmem:[%s2961_s3 + $0x2c] sm:$0xf] %vm1309_vm1, %v1455_v15  ;;  %v1002_v62 = vadd.f32 %v2499_v7, %v932_v59  ;;  %v864_v43 = vmul.f32 %v1539_v50, %v2192_v25  ;;  %v744_v6 = vadd.f32 1e-06, %v680_v13 }
 0x151   :  { %1322 = vst.msk [vmem:[%s2961_s3 + $0x30] sm:$0xf] %vm1309_vm1, %v1456_v21  ;;  %v1003_v14 = vadd.f32 %v2499_v7, %v933_v54  ;;  %v865_v2 = vmul.f32 %v1541_v22, %v2201_v31  ;;  %v745_v30 = vadd.f32 1e-06, %v681_v42  ;;  %v542_v34 = vpop.xlane.xlu1 %541  ;;  %v545_v18 = vpop.xlane.xlu0 %544 }
 0x152   :  { %v1457_v9 = vpack.c.bf16 %v1002_v62, %v1002_v62  ;;  %v934_v38 = vmul.f32 %v2493_v58, %v864_v43  ;;  %1554 = vrsqrt.f32 %v744_v6  ;;  %v682_v51 = vmul.f32 0.25, %v542_v34 }
 0x153   :  { %v1543_v63 = vpop.eup %1542  ;;  %v1458_v25 = vpack.c.bf16 %v1003_v14, %v1003_v14  ;;  %v935_v17 = vmul.f32 %v2493_v58, %v865_v2  ;;  %1556 = vrsqrt.f32 %v745_v30  ;;  %v683_v0 = vmul.f32 0.25, %v545_v18 }
 0x154   :  { %v1545_v1 = vpop.eup %1544  ;;  %1323 = vst.msk [vmem:[%s2961_s3 + $0x34] sm:$0xf] %vm1309_vm1, %v1457_v9  ;;  %v1004_v31 = vadd.f32 %v2499_v7, %v934_v38  ;;  %v866_v26 = vmul.f32 %v1543_v63, %v2204_v29  ;;  %v746_v55 = vadd.f32 1e-06, %v682_v51 }
 0x155   :  { %1324 = vst.msk [vmem:[%s2961_s3 + $0x38] sm:$0xf] %vm1309_vm1, %v1458_v25  ;;  %v1005_v10 = vadd.f32 %v2499_v7, %v935_v17  ;;  %v867_v46 = vmul.f32 %v1545_v1, %v2213_v8  ;;  %v747_v47 = vadd.f32 1e-06, %v683_v0  ;;  %v548_v5 = vpop.xlane.xlu1 %547  ;;  %v551_v39 = vpop.xlane.xlu0 %550 }
 0x156   :  { %v1459_v3 = vpack.c.bf16 %v1004_v31, %v1004_v31  ;;  %v936_v23 = vmul.f32 %v2493_v58, %v866_v26  ;;  %1558 = vrsqrt.f32 %v746_v55  ;;  %v684_v15 = vmul.f32 0.25, %v548_v5 }
 0x157   :  { %v1547_v59 = vpop.eup %1546  ;;  %v1460_v29 = vpack.c.bf16 %v1005_v10, %v1005_v10  ;;  %v937_v13 = vmul.f32 %v2493_v58, %v867_v46  ;;  %1560 = vrsqrt.f32 %v747_v47  ;;  %v685_v50 = vmul.f32 0.25, %v551_v39 }
 0x158   :  { %v1549_v21 = vpop.eup %1548  ;;  %1325 = vst.msk [vmem:[%s2961_s3 + $0x3c] sm:$0xf] %vm1309_vm1, %v1459_v3  ;;  %v1006_v8 = vadd.f32 %v2499_v7, %v936_v23  ;;  %v868_v54 = vmul.f32 %v1547_v59, %v2216_v33  ;;  %v748_v42 = vadd.f32 1e-06, %v684_v15 }
 0x159   :  { %1326 = vst.msk [vmem:[%s2961_s3 + $0x40] sm:$0xf] %vm1309_vm1, %v1460_v29  ;;  %v1007_v22 = vadd.f32 %v2499_v7, %v937_v13  ;;  %v869_v62 = vmul.f32 %v1549_v21, %v2225_v12  ;;  %v749_v43 = vadd.f32 1e-06, %v685_v50  ;;  %v554_v6 = vpop.xlane.xlu1 %553  ;;  %v557_v14 = vpop.xlane.xlu0 %556 }
 0x15a   :  { %v1461_v2 = vpack.c.bf16 %v1006_v8, %v1006_v8  ;;  %v938_v30 = vmul.f32 %v2493_v58, %v868_v54  ;;  %1562 = vrsqrt.f32 %v748_v42  ;;  %v686_v34 = vmul.f32 0.25, %v554_v6 }
 0x15b   :  { %v1551_v18 = vpop.eup %1550  ;;  %v1462_v33 = vpack.c.bf16 %v1007_v22, %v1007_v22  ;;  %v939_v9 = vmul.f32 %v2493_v58, %v869_v62  ;;  %1564 = vrsqrt.f32 %v749_v43  ;;  %v687_v38 = vmul.f32 0.25, %v557_v14 }
 0x15c   :  { %v1553_v51 = vpop.eup %1552  ;;  %1327 = vst.msk [vmem:[%s2961_s3 + $0x44] sm:$0xf] %vm1309_vm1, %v1461_v2  ;;  %v1008_v12 = vadd.f32 %v2499_v7, %v938_v30  ;;  %v870_v63 = vmul.f32 %v1551_v18, %v2228_v37  ;;  %v750_v25 = vadd.f32 1e-06, %v686_v34 }
 0x15d   :  { %1328 = vst.msk [vmem:[%s2961_s3 + $0x48] sm:$0xf] %vm1309_vm1, %v1462_v33  ;;  %v1009_v17 = vadd.f32 %v2499_v7, %v939_v9  ;;  %v871_v0 = vmul.f32 %v1553_v51, %v2237_v16  ;;  %v751_v1 = vadd.f32 1e-06, %v687_v38  ;;  %v560_v31 = vpop.xlane.xlu1 %559  ;;  %v563_v26 = vpop.xlane.xlu0 %562 }
 0x15e   :  { %v1463_v55 = vpack.c.bf16 %v1008_v12, %v1008_v12  ;;  %v940_v10 = vmul.f32 %v2493_v58, %v870_v63  ;;  %1566 = vrsqrt.f32 %v750_v25  ;;  %v688_v46 = vmul.f32 0.25, %v560_v31 }
 0x15f   :  { %v1555_v47 = vpop.eup %1554  ;;  %v1464_v37 = vpack.c.bf16 %v1009_v17, %v1009_v17  ;;  %v941_v5 = vmul.f32 %v2493_v58, %v871_v0  ;;  %1568 = vrsqrt.f32 %v751_v1  ;;  %v689_v39 = vmul.f32 0.25, %v563_v26 }
 0x160   :  { %v1557_v3 = vpop.eup %1556  ;;  %1329 = vst.msk [vmem:[%s2961_s3 + $0x4c] sm:$0xf] %vm1309_vm1, %v1463_v55  ;;  %v1010_v16 = vadd.f32 %v2499_v7, %v940_v10  ;;  %v872_v23 = vmul.f32 %v1555_v47, %v2240_v41  ;;  %v752_v15 = vadd.f32 1e-06, %v688_v46 }
 0x161   :  { %1330 = vst.msk [vmem:[%s2961_s3 + $0x50] sm:$0xf] %vm1309_vm1, %v1464_v37  ;;  %v1011_v59 = vadd.f32 %v2499_v7, %v941_v5  ;;  %v873_v29 = vmul.f32 %v1557_v3, %v2249_v20  ;;  %v753_v13 = vadd.f32 1e-06, %v689_v39  ;;  %v566_v50 = vpop.xlane.xlu1 %565  ;;  %v569_v21 = vpop.xlane.xlu0 %568 }
 0x162   :  { %v1465_v8 = vpack.c.bf16 %v1010_v16, %v1010_v16  ;;  %v942_v54 = vmul.f32 %v2493_v58, %v872_v23  ;;  %1570 = vrsqrt.f32 %v752_v15  ;;  %v690_v42 = vmul.f32 0.25, %v566_v50 }
 0x163   :  { %v1559_v22 = vpop.eup %1558  ;;  %v1466_v41 = vpack.c.bf16 %v1011_v59, %v1011_v59  ;;  %v943_v62 = vmul.f32 %v2493_v58, %v873_v29  ;;  %1572 = vrsqrt.f32 %v753_v13  ;;  %v691_v43 = vmul.f32 0.25, %v569_v21 }
 0x164   :  { %v1561_v6 = vpop.eup %1560  ;;  %1331 = vst.msk [vmem:[%s2961_s3 + $0x54] sm:$0xf] %vm1309_vm1, %v1465_v8  ;;  %v1012_v20 = vadd.f32 %v2499_v7, %v942_v54  ;;  %v874_v14 = vmul.f32 %v1559_v22, %v2252_v45  ;;  %v754_v2 = vadd.f32 1e-06, %v690_v42 }
 0x165   :  { %1332 = vst.msk [vmem:[%s2961_s3 + $0x58] sm:$0xf] %vm1309_vm1, %v1466_v41  ;;  %v1013_v30 = vadd.f32 %v2499_v7, %v943_v62  ;;  %v875_v34 = vmul.f32 %v1561_v6, %v2261_v24  ;;  %v755_v18 = vadd.f32 1e-06, %v691_v43  ;;  %v572_v33 = vpop.xlane.xlu1 %571  ;;  %v575_v9 = vpop.xlane.xlu0 %574 }
 0x166   :  { %v1467_v38 = vpack.c.bf16 %v1012_v20, %v1012_v20  ;;  %v944_v51 = vmul.f32 %v2493_v58, %v874_v14  ;;  %1574 = vrsqrt.f32 %v754_v2  ;;  %v692_v12 = vmul.f32 0.25, %v572_v33 }
 0x167   :  { %v1563_v63 = vpop.eup %1562  ;;  %v1468_v45 = vpack.c.bf16 %v1013_v30, %v1013_v30  ;;  %v945_v25 = vmul.f32 %v2493_v58, %v875_v34  ;;  %1576 = vrsqrt.f32 %v755_v18  ;;  %v693_v17 = vmul.f32 0.25, %v575_v9 }
 0x168   :  { %v1565_v0 = vpop.eup %1564  ;;  %1333 = vst.msk [vmem:[%s2961_s3 + $0x5c] sm:$0xf] %vm1309_vm1, %v1467_v38  ;;  %v1014_v24 = vadd.f32 %v2499_v7, %v944_v51  ;;  %v876_v1 = vmul.f32 %v1563_v63, %v2264_v49  ;;  %v756_v31 = vadd.f32 1e-06, %v692_v12 }
 0x169   :  { %1334 = vst.msk [vmem:[%s2961_s3 + $0x60] sm:$0xf] %vm1309_vm1, %v1468_v45  ;;  %v1015_v26 = vadd.f32 %v2499_v7, %v945_v25  ;;  %v877_v55 = vmul.f32 %v1565_v0, %v2273_v28  ;;  %v757_v10 = vadd.f32 1e-06, %v693_v17  ;;  %v578_v46 = vpop.xlane.xlu1 %577  ;;  %v581_v47 = vpop.xlane.xlu0 %580 }
 0x16a   :  { %v1469_v37 = vpack.c.bf16 %v1014_v24, %v1014_v24  ;;  %v946_v5 = vmul.f32 %v2493_v58, %v876_v1  ;;  %1578 = vrsqrt.f32 %v756_v31  ;;  %v694_v39 = vmul.f32 0.25, %v578_v46 }
 0x16b   :  { %v1567_v3 = vpop.eup %1566  ;;  %v1470_v49 = vpack.c.bf16 %v1015_v26, %v1015_v26  ;;  %v947_v16 = vmul.f32 %v2493_v58, %v877_v55  ;;  %1580 = vrsqrt.f32 %v757_v10  ;;  %v695_v23 = vmul.f32 0.25, %v581_v47 }
 0x16c   :  { %v1569_v15 = vpop.eup %1568  ;;  %1335 = vst.msk [vmem:[%s2961_s3 + $0x64] sm:$0xf] %vm1309_vm1, %v1469_v37  ;;  %v1016_v28 = vadd.f32 %v2499_v7, %v946_v5  ;;  %v878_v59 = vmul.f32 %v1567_v3, %v2276_v53  ;;  %v758_v29 = vadd.f32 1e-06, %v694_v39 }
 0x16d   :  { %1336 = vst.msk [vmem:[%s2961_s3 + $0x68] sm:$0xf] %vm1309_vm1, %v1470_v49  ;;  %v1017_v13 = vadd.f32 %v2499_v7, %v947_v16  ;;  %v879_v50 = vmul.f32 %v1569_v15, %v2285_v32  ;;  %v759_v21 = vadd.f32 1e-06, %v695_v23  ;;  %v584_v8 = vpop.xlane.xlu1 %583  ;;  %v587_v54 = vpop.xlane.xlu0 %586 }
 0x16e   :  { %v1471_v42 = vpack.c.bf16 %v1016_v28, %v1016_v28  ;;  %v948_v22 = vmul.f32 %v2493_v58, %v878_v59  ;;  %1582 = vrsqrt.f32 %v758_v29  ;;  %v696_v41 = vmul.f32 0.25, %v584_v8 }
 0x16f   :  { %v1571_v62 = vpop.eup %1570  ;;  %v1472_v53 = vpack.c.bf16 %v1017_v13, %v1017_v13  ;;  %v949_v43 = vmul.f32 %v2493_v58, %v879_v50  ;;  %1584 = vrsqrt.f32 %v759_v21  ;;  %v697_v6 = vmul.f32 0.25, %v587_v54 }
 0x170   :  { %v1573_v20 = vpop.eup %1572  ;;  %1337 = vst.msk [vmem:[%s2961_s3 + $0x6c] sm:$0xf] %vm1309_vm1, %v1471_v42  ;;  %v1018_v32 = vadd.f32 %v2499_v7, %v948_v22  ;;  %v880_v14 = vmul.f32 %v1571_v62, %v2288_v57  ;;  %v760_v2 = vadd.f32 1e-06, %v696_v41 }
 0x171   :  { %1338 = vst.msk [vmem:[%s2961_s3 + $0x70] sm:$0xf] %vm1309_vm1, %v1472_v53  ;;  %v1019_v30 = vadd.f32 %v2499_v7, %v949_v43  ;;  %v881_v34 = vmul.f32 %v1573_v20, %v2297_v36  ;;  %v761_v18 = vadd.f32 1e-06, %v697_v6  ;;  %v590_v33 = vpop.xlane.xlu1 %589  ;;  %v593_v9 = vpop.xlane.xlu0 %592 }
 0x172   :  { %v1473_v38 = vpack.c.bf16 %v1018_v32, %v1018_v32  ;;  %v950_v51 = vmul.f32 %v2493_v58, %v880_v14  ;;  %1586 = vrsqrt.f32 %v760_v2  ;;  %v698_v12 = vmul.f32 0.25, %v590_v33 }
 0x173   :  { %v1575_v63 = vpop.eup %1574  ;;  %v1474_v57 = vpack.c.bf16 %v1019_v30, %v1019_v30  ;;  %v951_v45 = vmul.f32 %v2493_v58, %v881_v34  ;;  %1588 = vrsqrt.f32 %v761_v18  ;;  %v699_v25 = vmul.f32 0.25, %v593_v9 }
 0x174   :  { %v1577_v17 = vpop.eup %1576  ;;  %1339 = vst.msk [vmem:[%s2961_s3 + $0x74] sm:$0xf] %vm1309_vm1, %v1473_v38  ;;  %v1020_v36 = vadd.f32 %v2499_v7, %v950_v51  ;;  %v882_v0 = vmul.f32 %v1575_v63, %v2300_v61  ;;  %v762_v24 = vadd.f32 1e-06, %v698_v12 }
 0x175   :  { %1340 = vst.msk [vmem:[%s2961_s3 + $0x78] sm:$0xf] %vm1309_vm1, %v1474_v57  ;;  %v1021_v1 = vadd.f32 %v2499_v7, %v951_v45  ;;  %v883_v31 = vmul.f32 %v1577_v17, %v2309_v40  ;;  %v763_v26 = vadd.f32 1e-06, %v699_v25  ;;  %v596_v55 = vpop.xlane.xlu1 %595  ;;  %v599_v10 = vpop.xlane.xlu0 %598 }
 0x176   :  { %v1475_v46 = vpack.c.bf16 %v1020_v36, %v1020_v36  ;;  %v952_v47 = vmul.f32 %v2493_v58, %v882_v0  ;;  %1590 = vrsqrt.f32 %v762_v24  ;;  %v700_v37 = vmul.f32 0.25, %v596_v55 }
 0x177   :  { %v1579_v5 = vpop.eup %1578  ;;  %v1476_v61 = vpack.c.bf16 %v1021_v1, %v1021_v1  ;;  %v953_v39 = vmul.f32 %v2493_v58, %v883_v31  ;;  %1592 = vrsqrt.f32 %v763_v26  ;;  %v701_v3 = vmul.f32 0.25, %v599_v10 }
 0x178   :  { %v1581_v49 = vpop.eup %1580  ;;  %1341 = vst.msk [vmem:[%s2961_s3 + $0x7c] sm:$0xf] %vm1309_vm1, %v1475_v46  ;;  %v1022_v40 = vadd.f32 %v2499_v7, %v952_v47  ;;  %v884_v16 = vmul.f32 %v1579_v5, %v2312_v4  ;;  %v764_v23 = vadd.f32 1e-06, %v700_v37 }
 0x179   :  { %1342 = vst.msk [vmem:[%s2961_s3 + $0x80] sm:$0xf] %vm1309_vm1, %v1476_v61  ;;  %v1023_v15 = vadd.f32 %v2499_v7, %v953_v39  ;;  %v885_v28 = vmul.f32 %v1581_v49, %v2321_v44  ;;  %v765_v59 = vadd.f32 1e-06, %v701_v3  ;;  %v602_v29 = vpop.xlane.xlu1 %601  ;;  %v605_v13 = vpop.xlane.xlu0 %604 }
 0x17a   :  { %v1477_v50 = vpack.c.bf16 %v1022_v40, %v1022_v40  ;;  %v954_v21 = vmul.f32 %v2493_v58, %v884_v16  ;;  %1594 = vrsqrt.f32 %v764_v23  ;;  %v702_v8 = vmul.f32 0.25, %v602_v29 }
 0x17b   :  { %v1583_v54 = vpop.eup %1582  ;;  %v1478_v4 = vpack.c.bf16 %v1023_v15, %v1023_v15  ;;  %v955_v42 = vmul.f32 %v2493_v58, %v885_v28  ;;  %1596 = vrsqrt.f32 %v765_v59  ;;  %v703_v22 = vmul.f32 0.25, %v605_v13 }
 0x17c   :  { %v1585_v41 = vpop.eup %1584  ;;  %1343 = vst.msk [vmem:[%s2961_s3 + $0x84] sm:$0xf] %vm1309_vm1, %v1477_v50  ;;  %v1024_v44 = vadd.f32 %v2499_v7, %v954_v21  ;;  %v886_v62 = vmul.f32 %v1583_v54, %v2324_v11  ;;  %v766_v53 = vadd.f32 1e-06, %v702_v8 }
 0x17d   :  { %1344 = vst.msk [vmem:[%s2961_s3 + $0x88] sm:$0xf] %vm1309_vm1, %v1478_v4  ;;  %v1025_v43 = vadd.f32 %v2499_v7, %v955_v42  ;;  %v887_v6 = vmul.f32 %v1585_v41, %v2333_v48  ;;  %v767_v20 = vadd.f32 1e-06, %v703_v22  ;;  %v608_v32 = vpop.xlane.xlu1 %607  ;;  %v611_v14 = vpop.xlane.xlu0 %610 }
 0x17e   :  { %v1479_v2 = vpack.c.bf16 %v1024_v44, %v1024_v44  ;;  %v956_v30 = vmul.f32 %v2493_v58, %v886_v62  ;;  %1598 = vrsqrt.f32 %v766_v53  ;;  %v704_v34 = vmul.f32 0.25, %v608_v32 }
 0x17f   :  { %v1587_v18 = vpop.eup %1586  ;;  %v1480_v11 = vpack.c.bf16 %v1025_v43, %v1025_v43  ;;  %v957_v33 = vmul.f32 %v2493_v58, %v887_v6  ;;  %1600 = vrsqrt.f32 %v767_v20  ;;  %v705_v9 = vmul.f32 0.25, %v611_v14  ;;  %v3042_v43 = vld [vmem:[#allocation16_spill] sm:$0xff]  ;;  %v3043_v14 = vld [vmem:[#allocation17_spill] sm:$0xff] }
 0x180   :  { %v1589_v38 = vpop.eup %1588  ;;  %1345 = vst.msk [vmem:[%s2961_s3 + $0x8c] sm:$0xf] %vm1309_vm1, %v1479_v2  ;;  %v1026_v48 = vadd.f32 %v2499_v7, %v956_v30  ;;  %v888_v51 = vmul.f32 %v1587_v18, %v2336_v19  ;;  %v768_v12 = vadd.f32 1e-06, %v704_v34 }
 0x181   :  { %1346 = vst.msk [vmem:[%s2961_s3 + $0x90] sm:$0xf] %vm1309_vm1, %v1480_v11  ;;  %v1027_v63 = vadd.f32 %v2499_v7, %v957_v33  ;;  %v889_v57 = vmul.f32 %v1589_v38, %v2345_v52  ;;  %v769_v45 = vadd.f32 1e-06, %v705_v9  ;;  %v614_v25 = vpop.xlane.xlu1 %613  ;;  %v617_v17 = vpop.xlane.xlu0 %616 }
 0x182   :  { %v1481_v36 = vpack.c.bf16 %v1026_v48, %v1026_v48  ;;  %v958_v0 = vmul.f32 %v2493_v58, %v888_v51  ;;  %1602 = vrsqrt.f32 %v768_v12  ;;  %v706_v24 = vmul.f32 0.25, %v614_v25 }
 0x183   :  { %v1591_v1 = vpop.eup %1590  ;;  %v1482_v19 = vpack.c.bf16 %v1027_v63, %v1027_v63  ;;  %v959_v31 = vmul.f32 %v2493_v58, %v889_v57  ;;  %1604 = vrsqrt.f32 %v769_v45  ;;  %v707_v26 = vmul.f32 0.25, %v617_v17  ;;  %v3044_v45 = vld [vmem:[#allocation18_spill] sm:$0xff] }
 0x184   :  { %v1593_v55 = vpop.eup %1592  ;;  %1347 = vst.msk [vmem:[%s2961_s3 + $0x94] sm:$0xf] %vm1309_vm1, %v1481_v36  ;;  %v1028_v52 = vadd.f32 %v2499_v7, %v958_v0  ;;  %v890_v10 = vmul.f32 %v1591_v1, %v2348_v27  ;;  %v770_v46 = vadd.f32 1e-06, %v706_v24  ;;  %v3045_v0 = vld [vmem:[#allocation19_spill] sm:$0xff] }
 0x185   :  { %1348 = vst.msk [vmem:[%s2961_s3 + $0x98] sm:$0xf] %vm1309_vm1, %v1482_v19  ;;  %v1029_v47 = vadd.f32 %v2499_v7, %v959_v31  ;;  %v891_v37 = vmul.f32 %v1593_v55, %v2357_v56  ;;  %v771_v5 = vadd.f32 1e-06, %v707_v26  ;;  %v620_v61 = vpop.xlane.xlu1 %619  ;;  %v623_v39 = vpop.xlane.xlu0 %622 }
 0x186   :  { %v1483_v3 = vpack.c.bf16 %v1028_v52, %v1028_v52  ;;  %v960_v49 = vmul.f32 %v2493_v58, %v890_v10  ;;  %1606 = vrsqrt.f32 %v770_v46  ;;  %v708_v40 = vmul.f32 0.25, %v620_v61 }
 0x187   :  { %v1595_v16 = vpop.eup %1594  ;;  %v1484_v27 = vpack.c.bf16 %v1029_v47, %v1029_v47  ;;  %v961_v23 = vmul.f32 %v2493_v58, %v891_v37  ;;  %1608 = vrsqrt.f32 %v771_v5  ;;  %v709_v15 = vmul.f32 0.25, %v623_v39  ;;  %v3046_v39 = vld [vmem:[#allocation20_spill] sm:$0xff] }
 0x188   :  { %v1597_v28 = vpop.eup %1596  ;;  %1349 = vst.msk [vmem:[%s2961_s3 + $0x9c] sm:$0xf] %vm1309_vm1, %v1483_v3  ;;  %v1030_v56 = vadd.f32 %v2499_v7, %v960_v49  ;;  %v892_v59 = vmul.f32 %v1595_v16, %v2360_v35  ;;  %v772_v29 = vadd.f32 1e-06, %v708_v40  ;;  %v3047_v16 = vld [vmem:[#allocation2_spill] sm:$0xff] }
 0x189   :  { %1350 = vst.msk [vmem:[%s2961_s3 + $0xa0] sm:$0xf] %vm1309_vm1, %v1484_v27  ;;  %v1031_v13 = vadd.f32 %v2499_v7, %v961_v23  ;;  %v893_v50 = vmul.f32 %v1597_v28, %v2369_v60  ;;  %v773_v21 = vadd.f32 1e-06, %v709_v15  ;;  %v626_v8 = vpop.xlane.xlu1 %625  ;;  %v629_v54 = vpop.xlane.xlu0 %628 }
 0x18a   :  { %v1485_v4 = vpack.c.bf16 %v1030_v56, %v1030_v56  ;;  %v962_v42 = vmul.f32 %v2493_v58, %v892_v59  ;;  %1610 = vrsqrt.f32 %v772_v29  ;;  %v710_v22 = vmul.f32 0.25, %v626_v8 }
 0x18b   :  { %v1599_v41 = vpop.eup %1598  ;;  %v1486_v35 = vpack.c.bf16 %v1031_v13, %v1031_v13  ;;  %v963_v44 = vmul.f32 %v2493_v58, %v893_v50  ;;  %1612 = vrsqrt.f32 %v773_v21  ;;  %v711_v62 = vmul.f32 0.25, %v629_v54 }
 0x18c   :  { %v1601_v53 = vpop.eup %1600  ;;  %1351 = vst.msk [vmem:[%s2961_s3 + $0xa4] sm:$0xf] %vm1309_vm1, %v1485_v4  ;;  %v1032_v60 = vadd.f32 %v2499_v7, %v962_v42  ;;  %v894_v6 = vmul.f32 %v1599_v41, %v3042_v43  ;;  %v774_v20 = vadd.f32 1e-06, %v710_v22  ;;  %v3048_v42 = vld [vmem:[#allocation3_spill] sm:$0xff] }
 0x18d   :  { %1352 = vst.msk [vmem:[%s2961_s3 + $0xa8] sm:$0xf] %vm1309_vm1, %v1486_v35  ;;  %v1033_v32 = vadd.f32 %v2499_v7, %v963_v44  ;;  %v895_v2 = vmul.f32 %v1601_v53, %v3043_v14  ;;  %v775_v30 = vadd.f32 1e-06, %v711_v62  ;;  %v632_v34 = vpop.xlane.xlu1 %631  ;;  %v635_v18 = vpop.xlane.xlu0 %634  ;;  %v3049_v44 = vld [vmem:[#allocation4_spill] sm:$0xff] }
 0x18e   :  { %v1487_v11 = vpack.c.bf16 %v1032_v60, %v1032_v60  ;;  %v964_v33 = vmul.f32 %v2493_v58, %v894_v6  ;;  %1614 = vrsqrt.f32 %v774_v20  ;;  %v712_v9 = vmul.f32 0.25, %v632_v34  ;;  %v2859_v6 = vld [vmem:[%s2959_s1] ss:$0 sm:$0xff] }
 0x18f   :  { %v1603_v38 = vpop.eup %1602  ;;  %v1488_v48 = vpack.c.bf16 %v1033_v32, %v1033_v32  ;;  %v965_v51 = vmul.f32 %v2493_v58, %v895_v2  ;;  %1616 = vrsqrt.f32 %v775_v30  ;;  %v713_v12 = vmul.f32 0.25, %v635_v18 }
 0x190   :  { %v1605_v63 = vpop.eup %1604  ;;  %1353 = vst.msk [vmem:[%s2961_s3 + $0xac] sm:$0xf] %vm1309_vm1, %v1487_v11  ;;  %v1034_v57 = vadd.f32 %v2499_v7, %v964_v33  ;;  %v896_v25 = vmul.f32 %v1603_v38, %v3044_v45  ;;  %v776_v17 = vadd.f32 1e-06, %v712_v9  ;;  %v3050_v33 = vld [vmem:[#allocation5_spill] sm:$0xff] }
 0x191   :  { %1354 = vst.msk [vmem:[%s2961_s3 + $0xb0] sm:$0xf] %vm1309_vm1, %v1488_v48  ;;  %v1035_v36 = vadd.f32 %v2499_v7, %v965_v51  ;;  %v897_v24 = vmul.f32 %v1605_v63, %v3045_v0  ;;  %v777_v1 = vadd.f32 1e-06, %v713_v12  ;;  %v638_v19 = vpop.xlane.xlu1 %637  ;;  %v641_v31 = vpop.xlane.xlu0 %640  ;;  %v3051_v51 = vld [vmem:[#allocation6_spill] sm:$0xff] }
 0x192   :  { %v1489_v26 = vpack.c.bf16 %v1034_v57, %v1034_v57  ;;  %v966_v55 = vmul.f32 %v2493_v58, %v896_v25  ;;  %1618 = vrsqrt.f32 %v776_v17  ;;  %v714_v52 = vmul.f32 0.25, %v638_v19 }
 0x193   :  { %v1607_v10 = vpop.eup %1606  ;;  %v1490_v46 = vpack.c.bf16 %v1035_v36, %v1035_v36  ;;  %v967_v47 = vmul.f32 %v2493_v58, %v897_v24  ;;  %1620 = vrsqrt.f32 %v777_v1  ;;  %v715_v37 = vmul.f32 0.25, %v641_v31  ;;  %v3052_v31 = vld [vmem:[#allocation7_spill] sm:$0xff] }
 0x194   :  { %v1609_v5 = vpop.eup %1608  ;;  %1355 = vst.msk [vmem:[%s2961_s3 + $0xb4] sm:$0xf] %vm1309_vm1, %v1489_v26  ;;  %v1036_v61 = vadd.f32 %v2499_v7, %v966_v55  ;;  %v898_v3 = vmul.f32 %v1607_v10, %v3046_v39  ;;  %v778_v49 = vadd.f32 1e-06, %v714_v52  ;;  %v3053_v10 = vld [vmem:[#allocation8_spill] sm:$0xff] }
 0x195   :  { %1356 = vst.msk [vmem:[%s2961_s3 + $0xb8] sm:$0xf] %vm1309_vm1, %v1490_v46  ;;  %v1037_v40 = vadd.f32 %v2499_v7, %v967_v47  ;;  %v899_v27 = vmul.f32 %v1609_v5, %v3047_v16  ;;  %v779_v23 = vadd.f32 1e-06, %v715_v37  ;;  %v644_v15 = vpop.xlane.xlu1 %643  ;;  %v647_v28 = vpop.xlane.xlu0 %646 }
 0x196   :  { %v1491_v56 = vpack.c.bf16 %v1036_v61, %v1036_v61  ;;  %v968_v59 = vmul.f32 %v2493_v58, %v898_v3  ;;  %1622 = vrsqrt.f32 %v778_v49  ;;  %v716_v29 = vmul.f32 0.25, %v644_v15 }
 0x197   :  { %v1611_v13 = vpop.eup %1610  ;;  %v1492_v50 = vpack.c.bf16 %v1037_v40, %v1037_v40  ;;  %v969_v21 = vmul.f32 %v2493_v58, %v899_v27  ;;  %1624 = vrsqrt.f32 %v779_v23  ;;  %v717_v8 = vmul.f32 0.25, %v647_v28  ;;  %v2852_v58 = vld [vmem:[%s2960_s2] ss:$0 sm:$0xff]  ;;  %v3054_v40 = vld [vmem:[#allocation9_spill] sm:$0xff] }
 0x198   :  { %v1613_v54 = vpop.eup %1612  ;;  %1357 = vst.msk [vmem:[%s2961_s3 + $0xbc] sm:$0xf] %vm1309_vm1, %v1491_v56  ;;  %v1038_v4 = vadd.f32 %v2499_v7, %v968_v59  ;;  %v900_v22 = vmul.f32 %v1611_v13, %v3048_v42  ;;  %v780_v41 = vadd.f32 1e-06, %v716_v29  ;;  %v3055_v23 = vld [vmem:[#allocation10_spill] sm:$0xff]  ;;  %v3057_v42 = vld [vmem:[#allocation12_spill] sm:$0xff] }
 0x199   :  { %1358 = vst.msk [vmem:[%s2961_s3 + $0xc0] sm:$0xf] %vm1309_vm1, %v1492_v50  ;;  %v1039_v35 = vadd.f32 %v2852_v58, %v969_v21  ;;  %v901_v62 = vmul.f32 %v1613_v54, %v3049_v44  ;;  %v781_v53 = vadd.f32 1e-06, %v717_v8  ;;  %v650_v60 = vpop.xlane.xlu1 %649  ;;  %v653_v7 = vpop.xlane.xlu0 %652  ;;  %v3056_v8 = vld [vmem:[#allocation11_spill] sm:$0xff] }
 0x19a   :  { %v1493_v43 = vpack.c.bf16 %v1038_v4, %v1038_v4  ;;  %v970_v20 = vmul.f32 %v2859_v6, %v900_v22  ;;  %1626 = vrsqrt.f32 %v780_v41  ;;  %v718_v32 = vmul.f32 0.25, %v650_v60 }
 0x19b   :  { %v1615_v14 = vpop.eup %1614  ;;  %v1494_v2 = vpack.c.bf16 %v1039_v35, %v1039_v35  ;;  %v971_v30 = vmul.f32 %v2859_v6, %v901_v62  ;;  %1628 = vrsqrt.f32 %v781_v53  ;;  %v719_v34 = vmul.f32 0.25, %v653_v7 }
 0x19c   :  { %v1617_v18 = vpop.eup %1616  ;;  %1359 = vst.msk [vmem:[%s2961_s3 + $0xc4] sm:$0xf] %vm1309_vm1, %v1493_v43  ;;  %v1040_v11 = vadd.f32 %v2852_v58, %v970_v20  ;;  %v902_v9 = vmul.f32 %v1615_v14, %v3050_v33  ;;  %v782_v38 = vadd.f32 1e-06, %v718_v32  ;;  %v3058_v43 = vld [vmem:[#allocation13_spill] sm:$0xff]  ;;  %v3059_v14 = vld [vmem:[#allocation14_spill] sm:$0xff] }
 0x19d   :  { %1360 = vst.msk [vmem:[%s2961_s3 + $0xc8] sm:$0xf] %vm1309_vm1, %v1494_v2  ;;  %v1041_v48 = vadd.f32 %v2852_v58, %v971_v30  ;;  %v903_v12 = vmul.f32 %v1617_v18, %v3051_v51  ;;  %v783_v63 = vadd.f32 1e-06, %v719_v34  ;;  %v656_v57 = vpop.xlane.xlu1 %655 }
 0x19e   :  { %v1495_v45 = vpack.c.bf16 %v1040_v11, %v1040_v11  ;;  %v972_v25 = vmul.f32 %v2859_v6, %v902_v9  ;;  %1630 = vrsqrt.f32 %v782_v38  ;;  %v720_v17 = vmul.f32 0.25, %v656_v57  ;;  %v3060_v38 = vld [vmem:[#allocation21_spill] sm:$0xff] }
 0x19f   :  { %v1619_v36 = vpop.eup %1618  ;;  %v1496_v0 = vpack.c.bf16 %v1041_v48, %v1041_v48  ;;  %v973_v24 = vmul.f32 %v2859_v6, %v903_v12  ;;  %1632 = vrsqrt.f32 %v783_v63 }
 0x1a0   :  { %v1621_v1 = vpop.eup %1620  ;;  %1361 = vst.msk [vmem:[%s2961_s3 + $0xcc] sm:$0xf] %vm1309_vm1, %v1495_v45  ;;  %v1042_v19 = vadd.f32 %v2852_v58, %v972_v25  ;;  %v904_v26 = vmul.f32 %v1619_v36, %v3052_v31  ;;  %v784_v55 = vadd.f32 1e-06, %v720_v17 }
 0x1a1   :  { %1362 = vst.msk [vmem:[%s2961_s3 + $0xd0] sm:$0xf] %vm1309_vm1, %v1496_v0  ;;  %v1043_v52 = vadd.f32 %v2852_v58, %v973_v24  ;;  %v905_v46 = vmul.f32 %v1621_v1, %v3053_v10 }
 0x1a2   :  { %v1497_v47 = vpack.c.bf16 %v1042_v19, %v1042_v19  ;;  %v974_v37 = vmul.f32 %v2859_v6, %v904_v26  ;;  %1634 = vrsqrt.f32 %v784_v55 }
 0x1a3   :  { %v1623_v5 = vpop.eup %1622  ;;  %v1498_v61 = vpack.c.bf16 %v1043_v52, %v1043_v52  ;;  %v975_v39 = vmul.f32 %v2859_v6, %v905_v46 }
 0x1a4   :  { %v1625_v3 = vpop.eup %1624  ;;  %1363 = vst.msk [vmem:[%s2961_s3 + $0xd4] sm:$0xf] %vm1309_vm1, %v1497_v47  ;;  %v1044_v49 = vadd.f32 %v2852_v58, %v974_v37  ;;  %v906_v16 = vmul.f32 %v1623_v5, %v3054_v40 }
 0x1a5   :  { %1364 = vst.msk [vmem:[%s2961_s3 + $0xd8] sm:$0xf] %vm1309_vm1, %v1498_v61  ;;  %v1045_v27 = vadd.f32 %v2852_v58, %v975_v39  ;;  %v907_v15 = vmul.f32 %v1625_v3, %v3055_v23 }
 0x1a6   :  { %v1499_v28 = vpack.c.bf16 %v1044_v49, %v1044_v49  ;;  %v976_v56 = vmul.f32 %v2859_v6, %v906_v16 }
 0x1a7   :  { %v1627_v59 = vpop.eup %1626  ;;  %v1500_v29 = vpack.c.bf16 %v1045_v27, %v1045_v27  ;;  %v977_v13 = vmul.f32 %v2859_v6, %v907_v15 }
 0x1a8   :  { %v1629_v50 = vpop.eup %1628  ;;  %1365 = vst.msk [vmem:[%s2961_s3 + $0xdc] sm:$0xf] %vm1309_vm1, %v1499_v28  ;;  %v1046_v21 = vadd.f32 %v2852_v58, %v976_v56  ;;  %v908_v54 = vmul.f32 %v1627_v59, %v3056_v8 }
 0x1a9   :  { %1366 = vst.msk [vmem:[%s2961_s3 + $0xe0] sm:$0xf] %vm1309_vm1, %v1500_v29  ;;  %v1047_v4 = vadd.f32 %v2852_v58, %v977_v13  ;;  %v909_v22 = vmul.f32 %v1629_v50, %v3057_v42 }
 0x1aa   :  { %v1501_v41 = vpack.c.bf16 %v1046_v21, %v1046_v21  ;;  %v978_v35 = vmul.f32 %v2859_v6, %v908_v54 }
 0x1ab   :  { %v1631_v44 = vpop.eup %1630  ;;  %v1502_v62 = vpack.c.bf16 %v1047_v4, %v1047_v4  ;;  %v979_v53 = vmul.f32 %v2859_v6, %v909_v22 }
 0x1ac   :  { %v1633_v60 = vpop.eup %1632  ;;  %1367 = vst.msk [vmem:[%s2961_s3 + $0xe4] sm:$0xf] %vm1309_vm1, %v1501_v41  ;;  %v1048_v7 = vadd.f32 %v2852_v58, %v978_v35  ;;  %v910_v20 = vmul.f32 %v1631_v44, %v3058_v43 }
 0x1ad   :  { %1368 = vst.msk [vmem:[%s2961_s3 + $0xe8] sm:$0xf] %vm1309_vm1, %v1502_v62  ;;  %v1049_v32 = vadd.f32 %v2852_v58, %v979_v53  ;;  %v911_v2 = vmul.f32 %v1633_v60, %v3059_v14 }
 0x1ae   :  { %v1503_v30 = vpack.c.bf16 %v1048_v7, %v1048_v7  ;;  %v980_v34 = vmul.f32 %v2859_v6, %v910_v20 }
 0x1af   :  { %v1635_v18 = vpop.eup %1634  ;;  %v1504_v11 = vpack.c.bf16 %v1049_v32, %v1049_v32  ;;  %v981_v33 = vmul.f32 %v2859_v6, %v911_v2 }
 0x1b0   :  { %1369 = vst.msk [vmem:[%s2961_s3 + $0xec] sm:$0xf] %vm1309_vm1, %v1503_v30  ;;  %v1050_v9 = vadd.f32 %v2852_v58, %v980_v34  ;;  %v912_v48 = vmul.f32 %v1635_v18, %v3060_v38 }
 0x1b1   :  { %1370 = vst.msk [vmem:[%s2961_s3 + $0xf0] sm:$0xf] %vm1309_vm1, %v1504_v11  ;;  %v1051_v51 = vadd.f32 %v2852_v58, %v981_v33 }
 0x1b2   :  { %v1505_v12 = vpack.c.bf16 %v1050_v9, %v1050_v9  ;;  %v982_v63 = vmul.f32 %v2859_v6, %v912_v48 }
 0x1b3   :  { %v1506_v57 = vpack.c.bf16 %v1051_v51, %v1051_v51 }
 0x1b4   :  { %1371 = vst.msk [vmem:[%s2961_s3 + $0xf4] sm:$0xf] %vm1309_vm1, %v1505_v12  ;;  %v1052_v45 = vadd.f32 %v2852_v58, %v982_v63 }
 0x1b5   :  { %1372 = vst.msk [vmem:[%s2961_s3 + $0xf8] sm:$0xf] %vm1309_vm1, %v1506_v57 }
 0x1b6   :  { %v1507_v25 = vpack.c.bf16 %v1052_v45, %v1052_v45 }
 0x1b8   :  { %1373 = vst.msk [vmem:[%s2961_s3 + $0xfc] sm:$0xf] %vm1309_vm1, %v1507_v25 }

</bundles_post_ra>
